<compile_context>
chip_gen: v7x
topology: tpu7x:2x2x1
jax: 0.10.0
libtpu: 0.0.40
codegen_flags: <defaults>
</compile_context>

<pallas_src>
import functools

import jax
import jax.numpy as jnp
from jax import lax
from jax.experimental import pallas as pl
from jax.experimental.pallas import tpu as pltpu

EPS = 1e-5


# ---------------------------------------------------------------------------
# Pallas kernel: fully fused BottleneckCSP forward for one batch element.
# ---------------------------------------------------------------------------
def _csp_kernel(x_ref, w1_ref, b1_ref, wb1_ref, bb1_ref, wb2_ref, bb2_ref,
                w2_ref, b2_ref, w3_ref, b3_ref, w4a_ref, w4b_ref, b4_ref,
                o_ref, *, n, H, W):
    HW = H * W
    f32 = jnp.float32

    def silu(v):
        return v * jax.nn.sigmoid(v)

    def leaky(v):
        return jnp.where(v >= 0, v, 0.1 * v)

    def mm(a, b):
        return jnp.dot(a, b, preferred_element_type=f32,
                       precision=jax.lax.Precision.HIGHEST)

    xf = x_ref[0].astype(f32)                                 # (c1, HW)

    # cv1: 1x1 conv + BN + SiLU (BN folded into w1/b1)
    t = silu(mm(w1_ref[...], xf) + b1_ref[...])               # (c_, HW)
    c_ = t.shape[0]

    # Border-column masks for the 3x3 taps (hoisted, loop-invariant).
    col = jax.lax.broadcasted_iota(jnp.int32, (1, HW), 1) % W
    mask_l = (col != 0).astype(f32)                           # kw == 0 taps
    mask_r = (col != (W - 1)).astype(f32)                     # kw == 2 taps
    zpad = jnp.zeros((c_, W + 1), f32)

    # Bottleneck chain (e=1.0, shortcut add since cin == cout).
    for i in range(n):
        u = silu(mm(wb1_ref[i], t) + bb1_ref[i])              # (c_, HW)
        # Row-padded flat copy: up[:, p + W + 1] == u[:, p].
        up = jnp.concatenate([zpad, u, zpad], axis=1)         # (c_, HW+2W+2)
        taps = []
        for kh in range(3):
            for kw in range(3):
                start = kh * W + kw                            # static offset
                p = up[:, start:start + HW]
                if kw == 0:
                    p = p * mask_l
                elif kw == 2:
                    p = p * mask_r
                taps.append(p)
        im2col = jnp.concatenate(taps, axis=0)                # (9*c_, HW)
        v = mm(wb2_ref[i], im2col) + bb2_ref[i]               # 3x3 conv + bias
        t = t + silu(v)                                       # shortcut add

    # cv3 (with first half of the post-concat BN folded in)
    y1 = mm(w3_ref[...], t) + b3_ref[...]
    # cv2 (with second half of the post-concat BN folded in)
    y2 = mm(w2_ref[...], xf) + b2_ref[...]
    # LeakyReLU(0.1) on the (virtual) concat, then cv4 = 1x1 conv + BN + SiLU.
    z = (mm(w4a_ref[...], leaky(y1)) + mm(w4b_ref[...], leaky(y2))
         + b4_ref[...])
    o_ref[0] = silu(z).astype(o_ref.dtype)                    # lane-dense store


# ---------------------------------------------------------------------------
# Wrapper
# ---------------------------------------------------------------------------
def bottleneck_csp_pallas(x, fused, *, n):
    """x: (B, c1, H, W) f32 NCHW; fused: dict of BN-folded weights/biases."""
    B, c1, H, W = x.shape
    HW = H * W
    c_ = fused["w1"].shape[0]
    c2 = fused["w4a"].shape[0]

    # Free reshape (merges contiguous trailing dims; no transpose, no HBM pad).
    xf = x.reshape(B, c1, HW)

    kernel = functools.partial(_csp_kernel, n=n, H=H, W=W)

    def full(arr):
        nd = arr.ndim
        return pl.BlockSpec(arr.shape, lambda b, _nd=nd: (0,) * _nd)

    out_flat = pl.pallas_call(
        kernel,
        out_shape=jax.ShapeDtypeStruct((B, c2, HW), x.dtype),
        grid_spec=pltpu.PrefetchScalarGridSpec(
            num_scalar_prefetch=0,
            grid=(B,),
            in_specs=[
                pl.BlockSpec((1, c1, HW), lambda b: (b, 0, 0)),
                full(fused["w1"]), full(fused["b1"]),
                full(fused["wb1"]), full(fused["bb1"]),
                full(fused["wb2"]), full(fused["bb2"]),
                full(fused["w2"]), full(fused["b2"]),
                full(fused["w3"]), full(fused["b3"]),
                full(fused["w4a"]), full(fused["w4b"]), full(fused["b4"]),
            ],
            out_specs=pl.BlockSpec((1, c2, HW), lambda b: (b, 0, 0)),
        ),
        compiler_params=pltpu.CompilerParams(
            dimension_semantics=("parallel",)),
    )(xf, fused["w1"], fused["b1"], fused["wb1"], fused["bb1"],
      fused["wb2"], fused["bb2"], fused["w2"], fused["b2"],
      fused["w3"], fused["b3"], fused["w4a"], fused["w4b"], fused["b4"])

    return out_flat.reshape(B, c2, H, W)


# ---------------------------------------------------------------------------
# Parameters (raw, PyTorch-style) + host-side BN folding
# ---------------------------------------------------------------------------
def init_params(key, c1, c2, n, e=0.5):
    c_ = int(c2 * e)
    keys = list(jax.random.split(key, 64))
    idx = [0]

    def nxt():
        k = keys[idx[0]]
        idx[0] += 1
        return k

    def conv_w(shape):
        return 0.3 * jax.random.normal(nxt(), shape, jnp.float32)

    def bn_p(c):
        return dict(
            gamma=1.0 + 0.1 * jax.random.normal(nxt(), (c,), jnp.float32),
            beta=0.1 * jax.random.normal(nxt(), (c,), jnp.float32),
            mean=0.1 * jax.random.normal(nxt(), (c,), jnp.float32),
            var=jax.random.uniform(nxt(), (c,), jnp.float32, 0.5, 1.5),
        )

    return dict(
        cv1_w=conv_w((c_, c1, 1, 1)), cv1_bn=bn_p(c_),
        cv2_w=conv_w((c_, c1, 1, 1)),
        cv3_w=conv_w((c_, c_, 1, 1)),
        cv4_w=conv_w((c2, 2 * c_, 1, 1)), cv4_bn=bn_p(c2),
        bn=bn_p(2 * c_),
        m=[dict(cv1_w=conv_w((c_, c_, 1, 1)), cv1_bn=bn_p(c_),
                cv2_w=conv_w((c_, c_, 3, 3)), cv2_bn=bn_p(c_))
           for _ in range(n)],
    )


def _fold_bn(w_oihw, bn):
    s = bn["gamma"] / jnp.sqrt(bn["var"] + EPS)
    return w_oihw * s[:, None, None, None], bn["beta"] - bn["mean"] * s


def fuse_params(p, c1, c2, n, e=0.5):
    assert n >= 1
    c_ = int(c2 * e)
    col = lambda v: v.reshape(-1, 1)

    w1, b1 = _fold_bn(p["cv1_w"], p["cv1_bn"])

    # Post-concat BN: channels [0:c_] act on y1 (cv3), [c_:2c_] on y2 (cv2).
    g, b, m, v = (p["bn"][k] for k in ("gamma", "beta", "mean", "var"))
    s1 = g[:c_] / jnp.sqrt(v[:c_] + EPS)
    s2 = g[c_:] / jnp.sqrt(v[c_:] + EPS)
    w3 = p["cv3_w"].reshape(c_, c_) * s1[:, None]
    b3 = b[:c_] - m[:c_] * s1
    w2 = p["cv2_w"].reshape(c_, c1) * s2[:, None]
    b2 = b[c_:] - m[c_:] * s2

    w4, b4 = _fold_bn(p["cv4_w"], p["cv4_bn"])
    w4 = w4.reshape(c2, 2 * c_)

    wb1, bb1, wb2, bb2 = [], [], [], []
    for blk in p["m"]:
        wa, ba = _fold_bn(blk["cv1_w"], blk["cv1_bn"])
        wc, bc = _fold_bn(blk["cv2_w"], blk["cv2_bn"])
        wb1.append(wa.reshape(c_, c_))
        bb1.append(col(ba))
        # OIHW -> (O, Kh, Kw, I) -> (O, 9*I): row order = tap-major then
        # input channel, matching the kernel's im2col concatenation.
        wb2.append(jnp.transpose(wc, (0, 2, 3, 1)).reshape(c_, 9 * c_))
        bb2.append(col(bc))

    return dict(
        w1=w1.reshape(c_, c1), b1=col(b1),
        w2=w2, b2=col(b2),
        w3=w3, b3=col(b3),
        w4a=w4[:, :c_], w4b=w4[:, c_:], b4=col(b4),
        wb1=jnp.stack(wb1), bb1=jnp.stack(bb1),
        wb2=jnp.stack(wb2), bb2=jnp.stack(bb2),
    )


# ---------------------------------------------------------------------------
# Pure-JAX reference (mirrors the PyTorch forward in eval mode, raw params)
# ---------------------------------------------------------------------------
def _conv(x, w, padding=0):
    return lax.conv_general_dilated(
        x, w, (1, 1), ((padding, padding), (padding, padding)),
        dimension_numbers=("NCHW", "OIHW", "NCHW"),
        precision=lax.Precision.HIGHEST)


def _bn(x, bn):
    s = bn["gamma"] / jnp.sqrt(bn["var"] + EPS)
    return ((x - bn["mean"][None, :, None, None]) * s[None, :, None, None]
            + bn["beta"][None, :, None, None])


def reference_forward(x, p, n):
    silu = lambda v: v * jax.nn.sigmoid(v)
    leaky = lambda v: jnp.where(v >= 0, v, 0.1 * v)

    t = silu(_bn(_conv(x, p["cv1_w"]), p["cv1_bn"]))              # cv1
    for i in range(n):                                            # self.m
        blk = p["m"][i]
        u = silu(_bn(_conv(t, blk["cv1_w"]), blk["cv1_bn"]))
        v = silu(_bn(_conv(u, blk["cv2_w"], padding=1), blk["cv2_bn"]))
        t = t + v                                                 # shortcut
    y1 = _conv(t, p["cv3_w"])                                     # cv3
    y2 = _conv(x, p["cv2_w"])                                     # cv2
    z = leaky(_bn(jnp.concatenate([y1, y2], axis=1), p["bn"]))    # bn + act
    return silu(_bn(_conv(z, p["cv4_w"]), p["cv4_bn"]))           # cv4


if __name__ == "__main__":
    key = jax.random.PRNGKey(0)
    kx, kp = jax.random.split(key)

    B, c1, c2, H, W, n = 2, 4, 4, 16, 16, 1
    x = jax.random.normal(kx, (B, c1, H, W), jnp.float32)

    params = init_params(kp, c1, c2, n)
    fused = fuse_params(params, c1, c2, n)

    out = bottleneck_csp_pallas(x, fused, n=n)
    out = jax.block_until_ready(out)

    ref = reference_forward(x, params, n)
    assert out.shape == (B, c2, H, W)
    err = float(jnp.max(jnp.abs(out - ref)))
    assert err < 1e-3, f"mismatch vs JAX reference: {err}"

    print("KERNEL_OK")
</pallas_src>

<mosaic_0001>
module attributes {stable_mosaic.version = 11 : i64} {
  func.func @_csp_kernel(%arg0: i32, %arg1: memref<1x4x256xf32, #tpu.memory_space<vmem>>, %arg2: memref<2x4xf32, #tpu.memory_space<vmem>>, %arg3: memref<2x1xf32, #tpu.memory_space<vmem>>, %arg4: memref<1x2x2xf32, #tpu.memory_space<vmem>>, %arg5: memref<1x2x1xf32, #tpu.memory_space<vmem>>, %arg6: memref<1x2x18xf32, #tpu.memory_space<vmem>>, %arg7: memref<1x2x1xf32, #tpu.memory_space<vmem>>, %arg8: memref<2x4xf32, #tpu.memory_space<vmem>>, %arg9: memref<2x1xf32, #tpu.memory_space<vmem>>, %arg10: memref<2x2xf32, #tpu.memory_space<vmem>>, %arg11: memref<2x1xf32, #tpu.memory_space<vmem>>, %arg12: memref<4x2xf32, #tpu.memory_space<vmem>>, %arg13: memref<4x2xf32, #tpu.memory_space<vmem>>, %arg14: memref<4x1xf32, #tpu.memory_space<vmem>>, %arg15: memref<1x4x256xf32, #tpu.memory_space<vmem>>) attributes {dimension_semantics = [#tpu.dimension_semantics<parallel>], iteration_bounds = array<i64: 2>, scalar_prefetch = 0 : i64, scratch_operands = 0 : i64, tpu.core_type = #tpu.core_type<tc>, window_params = [{transform_indices = @transform_0, window_bounds = array<i64: 1, 4, 256>}, {pipeline_mode = #tpu.pipeline_mode<synchronous>, transform_indices = @transform_1, window_bounds = array<i64: 2, 4>}, {pipeline_mode = #tpu.pipeline_mode<synchronous>, transform_indices = @transform_2, window_bounds = array<i64: 2, 1>}, {pipeline_mode = #tpu.pipeline_mode<synchronous>, transform_indices = @transform_3, window_bounds = array<i64: 1, 2, 2>}, {pipeline_mode = #tpu.pipeline_mode<synchronous>, transform_indices = @transform_4, window_bounds = array<i64: 1, 2, 1>}, {pipeline_mode = #tpu.pipeline_mode<synchronous>, transform_indices = @transform_5, window_bounds = array<i64: 1, 2, 18>}, {pipeline_mode = #tpu.pipeline_mode<synchronous>, transform_indices = @transform_6, window_bounds = array<i64: 1, 2, 1>}, {pipeline_mode = #tpu.pipeline_mode<synchronous>, transform_indices = @transform_7, window_bounds = array<i64: 2, 4>}, {pipeline_mode = #tpu.pipeline_mode<synchronous>, transform_indices = @transform_8, window_bounds = array<i64: 2, 1>}, {pipeline_mode = #tpu.pipeline_mode<synchronous>, transform_indices = @transform_9, window_bounds = array<i64: 2, 2>}, {pipeline_mode = #tpu.pipeline_mode<synchronous>, transform_indices = @transform_10, window_bounds = array<i64: 2, 1>}, {pipeline_mode = #tpu.pipeline_mode<synchronous>, transform_indices = @transform_11, window_bounds = array<i64: 4, 2>}, {pipeline_mode = #tpu.pipeline_mode<synchronous>, transform_indices = @transform_12, window_bounds = array<i64: 4, 2>}, {pipeline_mode = #tpu.pipeline_mode<synchronous>, transform_indices = @transform_13, window_bounds = array<i64: 4, 1>}, {transform_indices = @transform_14, window_bounds = array<i64: 1, 4, 256>}]} {
    %c0 = arith.constant 0 : index
    %c0_0 = arith.constant 0 : index
    %c0_1 = arith.constant 0 : index
    %0 = vector.load %arg1[%c0, %c0_0, %c0_1] : memref<1x4x256xf32, #tpu.memory_space<vmem>>, vector<1x4x256xf32>
    %1 = vector.shape_cast %0 : vector<1x4x256xf32> to vector<4x256xf32>
    %c0_2 = arith.constant 0 : index
    %c0_3 = arith.constant 0 : index
    %2 = vector.load %arg2[%c0_2, %c0_3] : memref<2x4xf32, #tpu.memory_space<vmem>>, vector<2x4xf32>
    %cst = arith.constant dense<0.000000e+00> : vector<2x256xf32>
    %3 = tpu.matmul %2, %1, %cst {dimension_numbers = #tpu.dot_dimension_numbers<[1], [0], [0], [1], [0, 0, 1, 1], [], []>, precision = #tpu.contract_precision<fp32>} : vector<2x4xf32>, vector<4x256xf32>, vector<2x256xf32> -> vector<2x256xf32>
    %c0_4 = arith.constant 0 : index
    %c0_5 = arith.constant 0 : index
    %4 = vector.load %arg3[%c0_4, %c0_5] : memref<2x1xf32, #tpu.memory_space<vmem>>, vector<2x1xf32>
    %5 = vector.broadcast %4 : vector<2x1xf32> to vector<2x256xf32>
    %6 = arith.addf %3, %5 : vector<2x256xf32>
    %7 = arith.negf %6 : vector<2x256xf32>
    %8 = math.exp %7 : vector<2x256xf32>
    %cst_6 = arith.constant 1.000000e+00 : f32
    %9 = vector.broadcast %cst_6 : f32 to vector<2x256xf32>
    %10 = arith.addf %9, %8 : vector<2x256xf32>
    %11 = arith.divf %9, %10 : vector<2x256xf32>
    %12 = arith.mulf %6, %11 : vector<2x256xf32>
    %13 = tpu.iota {dimensions = array<i32: 1>} : vector<1x256xi32>
    %c16_i32 = arith.constant 16 : i32
    %c0_i32 = arith.constant 0 : i32
    %14 = arith.cmpi eq, %c16_i32, %c0_i32 : i32
    %c1_i32 = arith.constant 1 : i32
    %15 = arith.select %14, %c1_i32, %c16_i32 : i32
    %16 = vector.broadcast %15 : i32 to vector<1x256xi32>
    %17 = arith.remsi %13, %16 : vector<1x256xi32>
    %c0_i32_7 = arith.constant 0 : i32
    %18 = vector.broadcast %c0_i32_7 : i32 to vector<1x256xi32>
    %19 = arith.cmpi ne, %17, %18 : vector<1x256xi32>
    %c0_i32_8 = arith.constant 0 : i32
    %20 = vector.broadcast %c0_i32_8 : i32 to vector<1x256xi32>
    %21 = arith.cmpi slt, %17, %20 : vector<1x256xi32>
    %c0_i32_9 = arith.constant 0 : i32
    %22 = arith.cmpi slt, %15, %c0_i32_9 : i32
    %23 = vector.broadcast %22 : i1 to vector<1x256xi1>
    %24 = vector.broadcast %23 : vector<1x256xi1> to vector<1x256xi1>
    %25 = arith.xori %21, %24 : vector<1x256xi1>
    %26 = arith.andi %25, %19 : vector<1x256xi1>
    %27 = vector.broadcast %15 : i32 to vector<1x256xi32>
    %28 = arith.addi %17, %27 : vector<1x256xi32>
    %29 = arith.select %26, %28, %17 : vector<1x256xi1>, vector<1x256xi32>
    %c0_i32_10 = arith.constant 0 : i32
    %30 = vector.broadcast %c0_i32_10 : i32 to vector<1x256xi32>
    %31 = arith.cmpi ne, %29, %30 : vector<1x256xi32>
    %32 = arith.extui %31 : vector<1x256xi1> to vector<1x256xi32>
    %33 = arith.sitofp %32 : vector<1x256xi32> to vector<1x256xf32>
    %c15_i32 = arith.constant 15 : i32
    %34 = vector.broadcast %c15_i32 : i32 to vector<1x256xi32>
    %35 = arith.cmpi ne, %29, %34 : vector<1x256xi32>
    %36 = arith.extui %35 : vector<1x256xi1> to vector<1x256xi32>
    %37 = arith.sitofp %36 : vector<1x256xi32> to vector<1x256xf32>
    %cst_11 = arith.constant 0.000000e+00 : f32
    %38 = vector.broadcast %cst_11 : f32 to vector<2x17xf32>
    %c0_12 = arith.constant 0 : index
    %c0_13 = arith.constant 0 : index
    %c0_14 = arith.constant 0 : index
    %39 = vector.load %arg4[%c0_12, %c0_13, %c0_14] : memref<1x2x2xf32, #tpu.memory_space<vmem>>, vector<1x2x2xf32>
    %40 = vector.shape_cast %39 : vector<1x2x2xf32> to vector<2x2xf32>
    %cst_15 = arith.constant dense<0.000000e+00> : vector<2x256xf32>
    %41 = tpu.matmul %40, %12, %cst_15 {dimension_numbers = #tpu.dot_dimension_numbers<[1], [0], [0], [1], [0, 0, 1, 1], [], []>, precision = #tpu.contract_precision<fp32>} : vector<2x2xf32>, vector<2x256xf32>, vector<2x256xf32> -> vector<2x256xf32>
    %c0_16 = arith.constant 0 : index
    %c0_17 = arith.constant 0 : index
    %c0_18 = arith.constant 0 : index
    %42 = vector.load %arg5[%c0_16, %c0_17, %c0_18] : memref<1x2x1xf32, #tpu.memory_space<vmem>>, vector<1x2x1xf32>
    %43 = vector.shape_cast %42 : vector<1x2x1xf32> to vector<2x1xf32>
    %44 = vector.broadcast %43 : vector<2x1xf32> to vector<2x256xf32>
    %45 = arith.addf %41, %44 : vector<2x256xf32>
    %46 = arith.negf %45 : vector<2x256xf32>
    %47 = math.exp %46 : vector<2x256xf32>
    %cst_19 = arith.constant 1.000000e+00 : f32
    %48 = vector.broadcast %cst_19 : f32 to vector<2x256xf32>
    %49 = arith.addf %48, %47 : vector<2x256xf32>
    %50 = arith.divf %48, %49 : vector<2x256xf32>
    %51 = arith.mulf %45, %50 : vector<2x256xf32>
    %52 = tpu.concatenate %38, %51, %38 in 1 : vector<2x17xf32>, vector<2x256xf32>, vector<2x17xf32> -> vector<2x290xf32>
    %53 = vector.extract_strided_slice %52 {offsets = [0, 0], sizes = [2, 256], strides = [1, 1]} : vector<2x290xf32> to vector<2x256xf32>
    %54 = vector.broadcast %33 : vector<1x256xf32> to vector<2x256xf32>
    %55 = arith.mulf %53, %54 : vector<2x256xf32>
    %56 = vector.extract_strided_slice %52 {offsets = [0, 1], sizes = [2, 256], strides = [1, 1]} : vector<2x290xf32> to vector<2x256xf32>
    %57 = vector.extract_strided_slice %52 {offsets = [0, 2], sizes = [2, 256], strides = [1, 1]} : vector<2x290xf32> to vector<2x256xf32>
    %58 = vector.broadcast %37 : vector<1x256xf32> to vector<2x256xf32>
    %59 = arith.mulf %57, %58 : vector<2x256xf32>
    %60 = vector.extract_strided_slice %52 {offsets = [0, 16], sizes = [2, 256], strides = [1, 1]} : vector<2x290xf32> to vector<2x256xf32>
    %61 = vector.broadcast %33 : vector<1x256xf32> to vector<2x256xf32>
    %62 = arith.mulf %60, %61 : vector<2x256xf32>
    %63 = vector.extract_strided_slice %52 {offsets = [0, 17], sizes = [2, 256], strides = [1, 1]} : vector<2x290xf32> to vector<2x256xf32>
    %64 = vector.extract_strided_slice %52 {offsets = [0, 18], sizes = [2, 256], strides = [1, 1]} : vector<2x290xf32> to vector<2x256xf32>
    %65 = vector.broadcast %37 : vector<1x256xf32> to vector<2x256xf32>
    %66 = arith.mulf %64, %65 : vector<2x256xf32>
    %67 = vector.extract_strided_slice %52 {offsets = [0, 32], sizes = [2, 256], strides = [1, 1]} : vector<2x290xf32> to vector<2x256xf32>
    %68 = vector.broadcast %33 : vector<1x256xf32> to vector<2x256xf32>
    %69 = arith.mulf %67, %68 : vector<2x256xf32>
    %70 = vector.extract_strided_slice %52 {offsets = [0, 33], sizes = [2, 256], strides = [1, 1]} : vector<2x290xf32> to vector<2x256xf32>
    %71 = vector.extract_strided_slice %52 {offsets = [0, 34], sizes = [2, 256], strides = [1, 1]} : vector<2x290xf32> to vector<2x256xf32>
    %72 = vector.broadcast %37 : vector<1x256xf32> to vector<2x256xf32>
    %73 = arith.mulf %71, %72 : vector<2x256xf32>
    %74 = tpu.concatenate %55, %56, %59, %62, %63, %66, %69, %70, %73 in 0 : vector<2x256xf32>, vector<2x256xf32>, vector<2x256xf32>, vector<2x256xf32>, vector<2x256xf32>, vector<2x256xf32>, vector<2x256xf32>, vector<2x256xf32>, vector<2x256xf32> -> vector<18x256xf32>
    %c0_20 = arith.constant 0 : index
    %c0_21 = arith.constant 0 : index
    %c0_22 = arith.constant 0 : index
    %75 = vector.load %arg6[%c0_20, %c0_21, %c0_22] : memref<1x2x18xf32, #tpu.memory_space<vmem>>, vector<1x2x18xf32>
    %76 = vector.shape_cast %75 : vector<1x2x18xf32> to vector<2x18xf32>
    %cst_23 = arith.constant dense<0.000000e+00> : vector<2x256xf32>
    %77 = tpu.matmul %76, %74, %cst_23 {dimension_numbers = #tpu.dot_dimension_numbers<[1], [0], [0], [1], [0, 0, 1, 1], [], []>, precision = #tpu.contract_precision<fp32>} : vector<2x18xf32>, vector<18x256xf32>, vector<2x256xf32> -> vector<2x256xf32>
    %c0_24 = arith.constant 0 : index
    %c0_25 = arith.constant 0 : index
    %c0_26 = arith.constant 0 : index
    %78 = vector.load %arg7[%c0_24, %c0_25, %c0_26] : memref<1x2x1xf32, #tpu.memory_space<vmem>>, vector<1x2x1xf32>
    %79 = vector.shape_cast %78 : vector<1x2x1xf32> to vector<2x1xf32>
    %80 = vector.broadcast %79 : vector<2x1xf32> to vector<2x256xf32>
    %81 = arith.addf %77, %80 : vector<2x256xf32>
    %82 = arith.negf %81 : vector<2x256xf32>
    %83 = math.exp %82 : vector<2x256xf32>
    %cst_27 = arith.constant 1.000000e+00 : f32
    %84 = vector.broadcast %cst_27 : f32 to vector<2x256xf32>
    %85 = arith.addf %84, %83 : vector<2x256xf32>
    %86 = arith.divf %84, %85 : vector<2x256xf32>
    %87 = arith.mulf %81, %86 : vector<2x256xf32>
    %88 = arith.addf %12, %87 : vector<2x256xf32>
    %c0_28 = arith.constant 0 : index
    %c0_29 = arith.constant 0 : index
    %89 = vector.load %arg10[%c0_28, %c0_29] : memref<2x2xf32, #tpu.memory_space<vmem>>, vector<2x2xf32>
    %cst_30 = arith.constant dense<0.000000e+00> : vector<2x256xf32>
    %90 = tpu.matmul %89, %88, %cst_30 {dimension_numbers = #tpu.dot_dimension_numbers<[1], [0], [0], [1], [0, 0, 1, 1], [], []>, precision = #tpu.contract_precision<fp32>} : vector<2x2xf32>, vector<2x256xf32>, vector<2x256xf32> -> vector<2x256xf32>
    %c0_31 = arith.constant 0 : index
    %c0_32 = arith.constant 0 : index
    %91 = vector.load %arg11[%c0_31, %c0_32] : memref<2x1xf32, #tpu.memory_space<vmem>>, vector<2x1xf32>
    %92 = vector.broadcast %91 : vector<2x1xf32> to vector<2x256xf32>
    %93 = arith.addf %90, %92 : vector<2x256xf32>
    %c0_33 = arith.constant 0 : index
    %c0_34 = arith.constant 0 : index
    %94 = vector.load %arg8[%c0_33, %c0_34] : memref<2x4xf32, #tpu.memory_space<vmem>>, vector<2x4xf32>
    %cst_35 = arith.constant dense<0.000000e+00> : vector<2x256xf32>
    %95 = tpu.matmul %94, %1, %cst_35 {dimension_numbers = #tpu.dot_dimension_numbers<[1], [0], [0], [1], [0, 0, 1, 1], [], []>, precision = #tpu.contract_precision<fp32>} : vector<2x4xf32>, vector<4x256xf32>, vector<2x256xf32> -> vector<2x256xf32>
    %c0_36 = arith.constant 0 : index
    %c0_37 = arith.constant 0 : index
    %96 = vector.load %arg9[%c0_36, %c0_37] : memref<2x1xf32, #tpu.memory_space<vmem>>, vector<2x1xf32>
    %97 = vector.broadcast %96 : vector<2x1xf32> to vector<2x256xf32>
    %98 = arith.addf %95, %97 : vector<2x256xf32>
    %c0_38 = arith.constant 0 : index
    %c0_39 = arith.constant 0 : index
    %99 = vector.load %arg12[%c0_38, %c0_39] : memref<4x2xf32, #tpu.memory_space<vmem>>, vector<4x2xf32>
    %cst_40 = arith.constant 0.000000e+00 : f32
    %100 = vector.broadcast %cst_40 : f32 to vector<2x256xf32>
    %101 = arith.cmpf oge, %93, %100 : vector<2x256xf32>
    %cst_41 = arith.constant 1.000000e-01 : f32
    %102 = vector.broadcast %cst_41 : f32 to vector<2x256xf32>
    %103 = arith.mulf %102, %93 : vector<2x256xf32>
    %104 = arith.select %101, %93, %103 : vector<2x256xi1>, vector<2x256xf32>
    %cst_42 = arith.constant dense<0.000000e+00> : vector<4x256xf32>
    %105 = tpu.matmul %99, %104, %cst_42 {dimension_numbers = #tpu.dot_dimension_numbers<[1], [0], [0], [1], [0, 0, 1, 1], [], []>, precision = #tpu.contract_precision<fp32>} : vector<4x2xf32>, vector<2x256xf32>, vector<4x256xf32> -> vector<4x256xf32>
    %c0_43 = arith.constant 0 : index
    %c0_44 = arith.constant 0 : index
    %106 = vector.load %arg13[%c0_43, %c0_44] : memref<4x2xf32, #tpu.memory_space<vmem>>, vector<4x2xf32>
    %cst_45 = arith.constant 0.000000e+00 : f32
    %107 = vector.broadcast %cst_45 : f32 to vector<2x256xf32>
    %108 = arith.cmpf oge, %98, %107 : vector<2x256xf32>
    %cst_46 = arith.constant 1.000000e-01 : f32
    %109 = vector.broadcast %cst_46 : f32 to vector<2x256xf32>
    %110 = arith.mulf %109, %98 : vector<2x256xf32>
    %111 = arith.select %108, %98, %110 : vector<2x256xi1>, vector<2x256xf32>
    %cst_47 = arith.constant dense<0.000000e+00> : vector<4x256xf32>
    %112 = tpu.matmul %106, %111, %cst_47 {dimension_numbers = #tpu.dot_dimension_numbers<[1], [0], [0], [1], [0, 0, 1, 1], [], []>, precision = #tpu.contract_precision<fp32>} : vector<4x2xf32>, vector<2x256xf32>, vector<4x256xf32> -> vector<4x256xf32>
    %113 = arith.addf %105, %112 : vector<4x256xf32>
    %c0_48 = arith.constant 0 : index
    %c0_49 = arith.constant 0 : index
    %114 = vector.load %arg14[%c0_48, %c0_49] : memref<4x1xf32, #tpu.memory_space<vmem>>, vector<4x1xf32>
    %115 = vector.broadcast %114 : vector<4x1xf32> to vector<4x256xf32>
    %116 = arith.addf %113, %115 : vector<4x256xf32>
    %117 = arith.negf %116 : vector<4x256xf32>
    %118 = math.exp %117 : vector<4x256xf32>
    %cst_50 = arith.constant 1.000000e+00 : f32
    %119 = vector.broadcast %cst_50 : f32 to vector<4x256xf32>
    %120 = arith.addf %119, %118 : vector<4x256xf32>
    %121 = arith.divf %119, %120 : vector<4x256xf32>
    %122 = arith.mulf %116, %121 : vector<4x256xf32>
    %c0_51 = arith.constant 0 : index
    %c0_52 = arith.constant 0 : index
    %c0_53 = arith.constant 0 : index
    %123 = vector.load %arg15[%c0_51, %c0_52, %c0_53] : memref<1x4x256xf32, #tpu.memory_space<vmem>>, vector<1x4x256xf32>
    %124 = vector.shape_cast %123 : vector<1x4x256xf32> to vector<4x256xf32>
    %125 = vector.shape_cast %122 : vector<4x256xf32> to vector<1x4x256xf32>
    tpu.vector_store %arg15[%c0_51, %c0_52, %c0_53], %125 {strides = array<i32>} : memref<1x4x256xf32, #tpu.memory_space<vmem>>, vector<1x4x256xf32>,
    return
  }
  func.func @transform_0(%arg0: i32) -> (i32, i32, i32) {
    %c0_i32 = arith.constant 0 : i32
    %c0_i32_0 = arith.constant 0 : i32
    %c0_i32_1 = arith.constant 0 : i32
    return %arg0, %c0_i32, %c0_i32_0 : i32, i32, i32
  }
  func.func @transform_1(%arg0: i32) -> (i32, i32) {
    %c0_i32 = arith.constant 0 : i32
    %c0_i32_0 = arith.constant 0 : i32
    %c0_i32_1 = arith.constant 0 : i32
    return %c0_i32, %c0_i32_0 : i32, i32
  }
  func.func @transform_2(%arg0: i32) -> (i32, i32) {
    %c0_i32 = arith.constant 0 : i32
    %c0_i32_0 = arith.constant 0 : i32
    %c0_i32_1 = arith.constant 0 : i32
    return %c0_i32, %c0_i32_0 : i32, i32
  }
  func.func @transform_3(%arg0: i32) -> (i32, i32, i32) {
    %c0_i32 = arith.constant 0 : i32
    %c0_i32_0 = arith.constant 0 : i32
    %c0_i32_1 = arith.constant 0 : i32
    %c0_i32_2 = arith.constant 0 : i32
    return %c0_i32, %c0_i32_0, %c0_i32_1 : i32, i32, i32
  }
  func.func @transform_4(%arg0: i32) -> (i32, i32, i32) {
    %c0_i32 = arith.constant 0 : i32
    %c0_i32_0 = arith.constant 0 : i32
    %c0_i32_1 = arith.constant 0 : i32
    %c0_i32_2 = arith.constant 0 : i32
    return %c0_i32, %c0_i32_0, %c0_i32_1 : i32, i32, i32
  }
  func.func @transform_5(%arg0: i32) -> (i32, i32, i32) {
    %c0_i32 = arith.constant 0 : i32
    %c0_i32_0 = arith.constant 0 : i32
    %c0_i32_1 = arith.constant 0 : i32
    %c0_i32_2 = arith.constant 0 : i32
    return %c0_i32, %c0_i32_0, %c0_i32_1 : i32, i32, i32
  }
  func.func @transform_6(%arg0: i32) -> (i32, i32, i32) {
    %c0_i32 = arith.constant 0 : i32
    %c0_i32_0 = arith.constant 0 : i32
    %c0_i32_1 = arith.constant 0 : i32
    %c0_i32_2 = arith.constant 0 : i32
    return %c0_i32, %c0_i32_0, %c0_i32_1 : i32, i32, i32
  }
  func.func @transform_7(%arg0: i32) -> (i32, i32) {
    %c0_i32 = arith.constant 0 : i32
    %c0_i32_0 = arith.constant 0 : i32
    %c0_i32_1 = arith.constant 0 : i32
    return %c0_i32, %c0_i32_0 : i32, i32
  }
  func.func @transform_8(%arg0: i32) -> (i32, i32) {
    %c0_i32 = arith.constant 0 : i32
    %c0_i32_0 = arith.constant 0 : i32
    %c0_i32_1 = arith.constant 0 : i32
    return %c0_i32, %c0_i32_0 : i32, i32
  }
  func.func @transform_9(%arg0: i32) -> (i32, i32) {
    %c0_i32 = arith.constant 0 : i32
    %c0_i32_0 = arith.constant 0 : i32
    %c0_i32_1 = arith.constant 0 : i32
    return %c0_i32, %c0_i32_0 : i32, i32
  }
  func.func @transform_10(%arg0: i32) -> (i32, i32) {
    %c0_i32 = arith.constant 0 : i32
    %c0_i32_0 = arith.constant 0 : i32
    %c0_i32_1 = arith.constant 0 : i32
    return %c0_i32, %c0_i32_0 : i32, i32
  }
  func.func @transform_11(%arg0: i32) -> (i32, i32) {
    %c0_i32 = arith.constant 0 : i32
    %c0_i32_0 = arith.constant 0 : i32
    %c0_i32_1 = arith.constant 0 : i32
    return %c0_i32, %c0_i32_0 : i32, i32
  }
  func.func @transform_12(%arg0: i32) -> (i32, i32) {
    %c0_i32 = arith.constant 0 : i32
    %c0_i32_0 = arith.constant 0 : i32
    %c0_i32_1 = arith.constant 0 : i32
    return %c0_i32, %c0_i32_0 : i32, i32
  }
  func.func @transform_13(%arg0: i32) -> (i32, i32) {
    %c0_i32 = arith.constant 0 : i32
    %c0_i32_0 = arith.constant 0 : i32
    %c0_i32_1 = arith.constant 0 : i32
    return %c0_i32, %c0_i32_0 : i32, i32
  }
  func.func @transform_14(%arg0: i32) -> (i32, i32, i32) {
    %c0_i32 = arith.constant 0 : i32
    %c0_i32_0 = arith.constant 0 : i32
    %c0_i32_1 = arith.constant 0 : i32
    return %arg0, %c0_i32, %c0_i32_0 : i32, i32, i32
  }
}

</mosaic_0001>

<bundles_post_ra>
// kernel: tpu_custom_call.1
= control target key start
LH: loop header
LB: loop body
LE: loop exit
PB: predicated region body
PF: predicated region fallthrough
CT: control target
= control target key end

     0   :  { %s5058_s0 = inlined_call_operand.vmem [shape: f32[2,4,256], index: 0, kind: input, shape index: {}]   ;;  %s5059_s1 = inlined_call_operand.vmem [shape: f32[2,4], index: 1, kind: input, shape index: {}]   ;;  %s5060_s2 = inlined_call_operand.vmem [shape: f32[2,1], index: 2, kind: input, shape index: {}]   ;;  %s5061_s3 = inlined_call_operand.vmem [shape: f32[1,2,2], index: 3, kind: input, shape index: {}]   ;;  %s5062_s4 = inlined_call_operand.vmem [shape: f32[1,2,1], index: 4, kind: input, shape index: {}]   ;;  %s5063_s5 = inlined_call_operand.vmem [shape: f32[1,2,18], index: 5, kind: input, shape index: {}]   ;;  %s5064_s6 = inlined_call_operand.vmem [shape: f32[1,2,1], index: 6, kind: input, shape index: {}]   ;;  %s5065_s7 = inlined_call_operand.vmem [shape: f32[2,4], index: 7, kind: input, shape index: {}]   ;;  %s5066_s8 = inlined_call_operand.vmem [shape: f32[2,1], index: 8, kind: input, shape index: {}]   ;;  %s5067_s9 = inlined_call_operand.vmem [shape: f32[2,2], index: 9, kind: input, shape index: {}]   ;;  %s5068_s10 = inlined_call_operand.vmem [shape: f32[2,1], index: 10, kind: input, shape index: {}]   ;;  %s5069_s11 = inlined_call_operand.vmem [shape: f32[4,2], index: 11, kind: input, shape index: {}]   ;;  %s5070_s12 = inlined_call_operand.vmem [shape: f32[4,2], index: 12, kind: input, shape index: {}]   ;;  %s5071_s13 = inlined_call_operand.vmem [shape: f32[4,1], index: 13, kind: input, shape index: {}]   ;;  %s5072_s14 = inlined_call_operand.hbm [shape: f32[2,4,256], index: 14, kind: output, shape index: {}]  }
   0x1   :  { %5073 = sst [smem:[#allocation5_spill]] %s5058_s0 }
   0x2   :  { %5074 = sst [smem:[#allocation6_spill]] %s5059_s1 }
   0x3   :  { %5075 = sst [smem:[#allocation7_spill]] %s5060_s2 }
   0x4   :  { %5076 = sst [smem:[#allocation8_spill]] %s5061_s3 }
   0x5   :  { %19 = vsyncpa [#allocation3], 0 }
   0x6   :  { %21 = vsyncpa [#allocation3 + $0x1], 0  ;;  %s4681_s29 = smov 0   ;;  %s4683_s30 = smov 0  }
   0x7   :  { %s4685_s15 = smov 0   ;;  %s4687_s16 = smov 0  }
   0x8 LB: > { %s4702_s17 = sadd.s32 4294967295, %s4587_s16   ;;  %s4278_s18 = sadd.s32 4294967294, %s4587_s16   ;;  %s4587_s16 = sphi %s4687_s16, %s5086_s16   ;;  %s4583_s15 = sphi %s4685_s15, %s5085_s15   ;;  %s4579_s30 = sphi %s4683_s30, %s5084_s30   ;;  %s4575_s29 = sphi %s4681_s29, %s5083_s29  }
   0x9   : > { %s4706_s19 = sadd.s32 1, %s4587_s16   ;;  %s333_s20 = sadd.s32 1, %s4583_s15 }
   0xa   : > { %s330_s21 = ssub.s32 %s4587_s16, %s4706_s19  ;;  %p343_p0 = scmp.ne.s32.totalorder %s4583_s15, %s4579_s30 }
   0xb   : > { %p331_p1 = scmp.eq.s32.totalorder %s330_s21, 0  ;;  %p344_p2 = scmp.eq.s32.totalorder %s4702_s17, 1 }
   0xc   : > { %p349_p3 = scmp.ne.s32.totalorder %s4579_s30, %s4575_s29  ;;  %p350_p4 = scmp.eq.s32.totalorder %s4278_s18, 1 }
   0xd   : > { %s4717_s22 = scalar_select %p331_p1, %s4583_s15, %s333_s20  }
   0xe   : > { %p4719_p5 = por %p344_p2, %p343_p0  ;;  %p4723_p6 = por %p350_p4, %p349_p3 }
   0xf   : > { %p4281_p7 = scmp.ge.s32.totalorder %s4587_s16, 1  ;;  %p415_p8 = scmp.lt.s32.totalorder %s4587_s16, 3 }
  0x11   : > { %p416_p9 = pnand %p4281_p7, %p415_p8 }
  0x12   : > { %p461_p10 = scmp.lt.s32.totalorder (!%p416_p9), %s4702_s17, 1  ;;  %s5079_s1 = sld [smem:[#allocation6_spill]] (!%p416_p9)  ;;  %vm476_vm0 = vcmask (!%p416_p9), 31744   ;;  %v4589_v1 = vmov (!%p416_p9), 0.0   ;;  %v4590_v5 = vmov (!%p416_p9), 0   ;;  %vm480_vm1 = vcmask (!%p416_p9), 1043456  }
  0x13   : > { %419 = sbr.rel (%p416_p9) target bundleno = 1816 (0x718), region = 76  ;;  %551 = vmatprep.mubr.f32.mxu0 (!%p416_p9), %v4589_v1  ;;  %s5080_s2 = sld [smem:[#allocation7_spill]] (!%p416_p9)  ;;  %1087 = vmatprep.mubr.f32.mxu1 (!%p416_p9), %v4589_v1  ;;  %v1004_v7 = vld [vmem:[%s5062_s4] sm:$0x3] (!%p416_p9)  ;;  %vm1010_vm2 = vcmask (!%p416_p9), 15360   ;;  %vm1014_vm3 = vcmask (!%p416_p9), 1041408   ;;  %v964_v59 = vlaneseq (!%p416_p9) }
  0x14   : > { %4465 = vset.pattern.permute.xlu0 (!%p416_p9), %v4590_v5  ;;  %4491 = vset.pattern.permute.xlu1 (!%p416_p9), %v4590_v5  ;;  %s5081_s0 = sld [smem:[#allocation5_spill]] (!%p416_p9)  ;;  %s5082_s3 = sld [smem:[#allocation8_spill]] (!%p416_p9)  ;;  %vm1506_vm8 = vcmask (!%p416_p9), 138240   ;;  %vm1546_vm9 = vcmask (!%p416_p9), 146432   ;;  %vm1558_vm10 = vcmask (!%p416_p9), 261120   ;;  %vm1534_vm11 = vcmask (!%p416_p9), 130048  }
  0x15   : > { %v965_v60 = vand.u32 (!%p416_p9), 127, %v964_v59  ;;  %s4593_s21 = smov (!%p416_p9), 2   ;;  %s4594_s25 = smov (!%p416_p9), 34   ;;  %vm1570_vm12 = vcmask (!%p416_p9), 277504   ;;  %vm1651_vm13 = vcmask (!%p416_p9), 900096   ;;  %vm1634_vm14 = vcmask (!%p416_p9), 908288  }
  0x16   : > { %s4595_s26 = smov (!%p416_p9), 17   ;;  %s4598_s28 = smov (!%p416_p9), 127   ;;  %vm1589_vm15 = vcmask (!%p416_p9), 1039360  }
  0x17   : > { %v966_v61 = vadd.s32 (!%p416_p9), 128, %v965_v60  ;;  %v971_v62 = vand.u32 (!%p416_p9), 15, %v965_v60 }
  0x18   : > { %v467_v0 = vld [vmem:[%s5079_s1] sm:$0x3] (!%p416_p9)  ;;  %s4597_s1 = smov (!%p416_p9), 111  }
  0x19   : > { %v478_v2 = vsel (!%p416_p9), %vm476_vm0, %v467_v0, 0  ;;  %v468_v3 = vld [vmem:[%s5080_s2] sm:$0x3] (!%p416_p9)  ;;  %v978_v63 = vand.u32 (!%p416_p9), 15, %v966_v61  ;;  %vm997_vm4 = vcmp.ne.s32.totalorder (!%p416_p9), %v971_v62, 15  ;;  %vm991_vm6 = vcmp.ne.s32.totalorder (!%p416_p9), %v971_v62, 0 }
  0x1a   : > { %s462_s18 = scalar_select %p461_p10, %s4702_s17, 1  ;;  %v552_v4 = vand.u32 4294901760, %v478_v2  ;;  %471 = vperm.xlu0 %4465, %v468_v3   ;;  %v1003_v32 = vld [vmem:[%s5082_s3] sm:$0x3]  ;;  %v4289_v0 = vsel %vm997_vm4, 1.0, %v4589_v1  ;;  %vm1606_vm4 = vcmask 1031168  }
  0x1b   : > { %v1012_v33 = vsel %vm1010_vm2, %v1003_v32, 0  ;;  %vm998_vm5 = vcmp.ne.s32.totalorder %v978_v63, 15  ;;  %vm992_vm7 = vcmp.ne.s32.totalorder %v978_v63, 0 }
  0x1c   : > { %s4302_s20 = sshll.u32 %s462_s18, 3  ;;  %v553_v6 = vsub.f32 %v478_v2, %v552_v4  ;;  %v1088_v38 = vand.u32 4294901760, %v1012_v33  ;;  %v4290_v2 = vsel %vm998_vm5, 1.0, %v4589_v1  ;;  %s4591_s18 = smov 18   ;;  %v4814_v5 = vsel %vm992_vm7, 1.0, %v4589_v1 }
  0x1d   : > { %s465_s27 = scalar_lea.vmem %s5081_s0, %s4302_s20  ;;  %v4466_v3 = vpack.i.bf16 %v4290_v2, %v4289_v0  ;;  %s4592_s20 = smov 32   ;;  %vm1682_vm5 = vcmask 777216   ;;  %vm1703_vm7 = vcmask 1045504  }
  0x1e   : > { %v466_v8 = vld [vmem:[%s465_s27] sm:$0xff]  ;;  %v554_v9 = vand.u32 4294901760, %v553_v6  ;;  %1007 = vperm.xlu0 %4465, %v1004_v7   ;;  %v1089_v39 = vsub.f32 %v1012_v33, %v1088_v38  ;;  %s4596_s27 = smov 16   ;;  %s458_s0 = sand.u32 1, %s4579_s30  }
  0x1f   : > { %v475_v10 = vcombine.high %v466_v8, %v466_v8  ;;  %v481_v11 = vsel %vm480_vm1, %v466_v8, 0  ;;  %4472 = vrot.lane.b32.xlu1 %v4466_v3, %s4593_s21  ;;  %s4601_s21 = smov 110  }
  0x20   : > { %v4747_v12 = vand.u32 4294901760, %v481_v11  ;;  %v555_v13 = vsub.f32 %v553_v6, %v554_v9  ;;  %v1090_v40 = vand.u32 4294901760, %v1089_v39 }
  0x21   : > { %v483_v14 = vsel %vm480_vm1, %v475_v10, 0 }
  0x22   : > { %v4750_v15 = vand.u32 4294901760, %v483_v14  ;;  %v556_v16 = vand.u32 4294901760, %v555_v13  ;;  %v4753_v17 = vsub.f32 %v481_v11, %v4747_v12  ;;  %v1091_v44 = vsub.f32 %v1089_v39, %v1090_v40  ;;  %4467 = vrot.lane.b32.xlu0 %v4466_v3, %s4591_s18  ;;  %s4599_s18 = smov 95  }
  0x24   : > { %486 = vmatprep.subr.mxu0 %v4750_v15  ;;  %v4757_v18 = vsub.f32 %v483_v14, %v4750_v15  ;;  %v4760_v19 = vand.u32 4294901760, %v4753_v17  ;;  %v1092_v50 = vand.u32 4294901760, %v1091_v44 }
  0x25   : > { %488 = vmatpush1.msra.mxu0 %v4747_v12 }
  0x26   : > { %557 = vmatmul.mubr.f32.vlgmr.msra.gmra.mrb[0].mxu0 %v556_v16  ;;  %v4764_v20 = vand.u32 4294901760, %v4757_v18  ;;  %v572_v21 = vsub.f32 %v4753_v17, %v4760_v19 }
  0x27   : > { %637 = vmatprep.mubr.f32.mxu0 %v4589_v1 }
  0x28   : > { %v566_v22 = vsub.f32 %v4757_v18, %v4764_v20  ;;  %v4771_v23 = vand.u32 4294901760, %v572_v21 }
  0x2a   : > { %v4773_v24 = vand.u32 4294901760, %v566_v22 }
  0x2c   : > { %568 = vmatprep.subr.mxu0 %v4773_v24 }
  0x2d   : > { %574 = vmatpush1.msra.mxu0 %v4771_v23 }
  0x2e   : > { %639 = vmatmul.mubr.f32.vlgmr.msra.gmra.mrb[0].mxu0 %v552_v4  ;;  %647 = vmatprep.subr.mxu0 %v4757_v18 }
  0x2f   : > { %650 = vmatpush1.msra.mxu0 %v4753_v17  ;;  %713 = vmatprep.mubr.f32.mxu0 %v4589_v1 }
  0x30   : > { %723 = vmatprep.subr.mxu0 %v4750_v15 }
  0x36   : > { %716 = vmatmul.mubr.f32.vlgmr.msra.gmra.mrb[0].mxu0 %v553_v6 }
  0x37   : > { %725 = vmatpush1.msra.mxu0 %v4747_v12  ;;  %788 = vmatprep.mubr.f32.mxu0 %v4589_v1 }
  0x38   : > { %801 = vmatprep.subr.mxu0 %v4764_v20 }
  0x3e   : > { %792 = vmatmul.mubr.f32.vlgmr.msra.gmra.mrb[0].mxu0 %v554_v9 }
  0x3f   : > { %805 = vmatpush1.msra.mxu0 %v4760_v19  ;;  %868 = vmatprep.mubr.f32.mxu0 %v4589_v1 }
  0x40   : > { %877 = vmatprep.subr.mxu0 %v4750_v15 }
  0x46   : > { %870 = vmatmul.mubr.f32.vlgmr.msra.gmra.mrb[0].mxu0 %v552_v4 }
  0x47   : > { %879 = vmatpush1.msra.mxu0 %v4747_v12  ;;  %942 = vmatprep.mubr.f32.mxu0 %v4589_v1 }
  0x4e   : > { %944 = vmatmul.mubr.f32.vlgmr.msra.gmra.mrb[0].mxu0 %v552_v4  ;;  %v4811_v4 = vsel %vm991_vm6, 1.0, %v4589_v1  ;;  %vm1668_vm6 = vcmask 785408  }
  0x4f   : > { %2065 = vmatprep.mubr.f32.mxu0 %v4589_v1  ;;  %v4476_v6 = vpack.i.bf16 %v4814_v5, %v4811_v4 }
  0x51   : > { %4477 = vrot.lane.b32.xlu0 %v4476_v6, %s4592_s20  ;;  %s4600_s20 = smov 126  }
  0x55   : > { %4487 = vrot.lane.b32.xlu0 %v4466_v3, %s4594_s25  ;;  %s4602_s25 = smov 112  }
  0x99   : > { %v472_v25 = vpop.permute.xlu0 %471 }
  0x9d   : > { %v1008_v7 = vpop.permute.xlu0 %1007 }
 0x121   : > { %v945_v26 = vpop.f32.mrb[0].mxu0 }
 0x122   : > { %v4328_v27 = vadd.f32 %v945_v26, %v472_v25  ;;  %v947_v28 = vpop.f32.mrb[1].mxu0 }
 0x123   : > { %v4329_v29 = vadd.f32 %v947_v28, %v472_v25 }
 0x124   : > { %v4285_v30 = vmul.f32 -1.442695, %v4328_v27 }
 0x125   : > { %v4286_v31 = vmul.f32 -1.442695, %v4329_v29 }
 0x126   : > { %4493 = vpow2.f32 %v4285_v30  ;;  %v4473_v30 = vpop.permute.xlu1 %4472 }
 0x127   : > { %4495 = vpow2.f32 %v4286_v31 }
 0x130   : > { %v4494_v34 = vpop.eup %4493 }
 0x131   : > { %v4496_v35 = vpop.eup %4495  ;;  %v956_v36 = vadd.f32 1.0, %v4494_v34 }
 0x132   : > { %v957_v37 = vadd.f32 1.0, %v4496_v35 }
 0x133   : > { %4497 = vrcp.f32 %v956_v36  ;;  %v4468_v36 = vpop.permute.xlu0 %4467 }
 0x134   : > { %4499 = vrcp.f32 %v957_v37 }
 0x13d   : > { %v4498_v41 = vpop.eup %4497 }
 0x13e   : > { %v4500_v42 = vpop.eup %4499  ;;  %v4794_v43 = vmul.f32 %v4498_v41, %v4328_v27  ;;  %v4469_v41 = vunpack.i.l.bf16 %v4468_v36 }
 0x13f   : > { %v4796_v45 = vmul.f32 %v4500_v42, %v4329_v29 }
 0x140   : > { %v1016_v46 = vsel %vm1014_vm3, %v4794_v43, 0 }
 0x141   : > { %v1023_v47 = vand.u32 4294901760, %v1016_v46  ;;  %v1019_v48 = vsel %vm1014_vm3, %v4796_v45, 0 }
 0x142   : > { %v1021_v49 = vand.u32 4294901760, %v1019_v48 }
 0x143   : > { %v1106_v51 = vsub.f32 %v1016_v46, %v1023_v47 }
 0x144   : > { %v1100_v52 = vsub.f32 %v1019_v48, %v1021_v49  ;;  %1022 = vmatprep.subr.mxu1 %v1021_v49  ;;  %v4478_v48 = vpop.permute.xlu0 %4477 }
 0x145   : > { %1024 = vmatpush1.msra.mxu1 %v1023_v47  ;;  %v1107_v53 = vand.u32 4294901760, %v1106_v51  ;;  %v4480_v60 = vunpack.i.h.bf16 %v4478_v48 }
 0x146   : > { %1093 = vmatmul.mubr.f32.vlgmr.msra.gmra.mrb[0].mxu1 %v1092_v50  ;;  %v1101_v54 = vand.u32 4294901760, %v1100_v52  ;;  %v4479_v50 = vunpack.i.l.bf16 %v4478_v48 }
 0x147   : > { %v1108_v55 = vsub.f32 %v1106_v51, %v1107_v53  ;;  %1173 = vmatprep.mubr.f32.mxu1 %v4589_v1 }
 0x148   : > { %v1102_v56 = vsub.f32 %v1100_v52, %v1101_v54 }
 0x149   : > { %v1109_v58 = vand.u32 4294901760, %v1108_v55  ;;  %v4475_v55 = vunpack.i.h.bf16 %v4473_v30 }
 0x14a   : > { %v1103_v57 = vand.u32 4294901760, %v1102_v56 }
 0x14c   : > { %1104 = vmatprep.subr.mxu1 %v1103_v57 }
 0x14d   : > { %1110 = vmatpush1.msra.mxu1 %v1109_v58 }
 0x14e   : > { %1175 = vmatmul.mubr.f32.vlgmr.msra.gmra.mrb[0].mxu1 %v1088_v38  ;;  %1183 = vmatprep.subr.mxu1 %v1100_v52 }
 0x14f   : > { %1186 = vmatpush1.msra.mxu1 %v1106_v51  ;;  %1249 = vmatprep.mubr.f32.mxu1 %v4589_v1 }
 0x150   : > { %1259 = vmatprep.subr.mxu1 %v1021_v49 }
 0x156   : > { %1252 = vmatmul.mubr.f32.vlgmr.msra.gmra.mrb[0].mxu1 %v1089_v39 }
 0x157   : > { %1261 = vmatpush1.msra.mxu1 %v1023_v47  ;;  %1324 = vmatprep.mubr.f32.mxu1 %v4589_v1 }
 0x158   : > { %1337 = vmatprep.subr.mxu1 %v1101_v54 }
 0x15e   : > { %1328 = vmatmul.mubr.f32.vlgmr.msra.gmra.mrb[0].mxu1 %v1090_v40  ;;  %v4474_v40 = vunpack.i.l.bf16 %v4473_v30 }
 0x15f   : > { %1341 = vmatpush1.msra.mxu1 %v1107_v53  ;;  %1404 = vmatprep.mubr.f32.mxu1 %v4589_v1 }
 0x160   : > { %1413 = vmatprep.subr.mxu1 %v1021_v49  ;;  %v4470_v49 = vunpack.i.h.bf16 %v4468_v36  ;;  %v1521_v62 = vsel %vm1010_vm2, %v4474_v40, %v4475_v55 }
 0x162   : > { %v1547_v61 = vsel %vm1546_vm9, %v4469_v41, %v4470_v49 }
 0x166   : > { %1406 = vmatmul.mubr.f32.vlgmr.msra.gmra.mrb[0].mxu1 %v1088_v38 }
 0x167   : > { %1415 = vmatpush1.msra.mxu1 %v1023_v47  ;;  %1478 = vmatprep.mubr.f32.mxu1 %v4589_v1 }
 0x16e   : > { %1480 = vmatmul.mubr.f32.vlgmr.msra.gmra.mrb[0].mxu1 %v1088_v38 }
 0x16f   : > { %1796 = vmatprep.mubr.f32.mxu1 %v4589_v1 }
 0x241   : > { %v1481_v8 = vpop.f32.mrb[0].mxu1 }
 0x242   : > { %v4330_v9 = vadd.f32 %v1481_v8, %v1008_v7  ;;  %v1483_v10 = vpop.f32.mrb[1].mxu1 }
 0x243   : > { %v4331_v11 = vadd.f32 %v1483_v10, %v1008_v7 }
 0x244   : > { %v4291_v13 = vmul.f32 -1.442695, %v4330_v9 }
 0x245   : > { %v4292_v14 = vmul.f32 -1.442695, %v4331_v11 }
 0x246   : > { %4501 = vpow2.f32 %v4291_v13  ;;  %v4488_v13 = vpop.permute.xlu0 %4487 }
 0x247   : > { %4503 = vpow2.f32 %v4292_v14 }
 0x250   : > { %v4502_v16 = vpop.eup %4501 }
 0x251   : > { %v4504_v21 = vpop.eup %4503  ;;  %v1492_v22 = vadd.f32 1.0, %v4502_v16 }
 0x252   : > { %v1493_v25 = vadd.f32 1.0, %v4504_v21 }
 0x253   : > { %4505 = vrcp.f32 %v1492_v22 }
 0x254   : > { %4507 = vrcp.f32 %v1493_v25  ;;  %v4490_v25 = vunpack.i.h.bf16 %v4488_v13 }
 0x25d   : > { %v4506_v26 = vpop.eup %4505 }
 0x25e   : > { %v1498_v27 = vmul.f32 %v4506_v26, %v4330_v9  ;;  %v4508_v28 = vpop.eup %4507 }
 0x25f   : > { %v1499_v29 = vmul.f32 %v4508_v28, %v4331_v11 }
 0x260   : > { %1502 = vrot.lane.b32.xlu1 %v1498_v27, %s4595_s26  ;;  %v4489_v27 = vunpack.i.l.bf16 %v4488_v13 }
 0x264   : > { %1504 = vrot.lane.b32.xlu1 %v1499_v29, %s4595_s26  ;;  %s4603_s26 = smov 96  }
 0x268   : > { %4482 = vrot.lane.b32.xlu1 %v4476_v6, %s4596_s27  ;;  %v1559_v6 = vsel %vm1558_vm10, %v4479_v50, %v4480_v60  ;;  %s4604_s27 = smov 94  }
 0x2d2   : > { %v1503_v31 = vpop.permute.xlu1 %1502 }
 0x2d3   : > { %v4818_v32 = vsel %vm1506_vm8, 0.0, %v1503_v31 }
 0x2d4   : > { %1628 = vrot.lane.b32.xlu0 %v4818_v32, %s4597_s1  ;;  %v1580_v38 = vrot.slane %v4818_v32, 6  ;;  %v1525_v47 = vmul.f32 %v4474_v40, %v4818_v32  ;;  %v1551_v54 = vmul.f32 %v4469_v41, %v4818_v32  ;;  %v1563_v58 = vmul.f32 %v4479_v50, %v4818_v32  ;;  %v4177_v41 = vld [vmem:[%s5071_s13] sm:$0xf] }
 0x2d6   : > { %v1505_v33 = vpop.permute.xlu1 %1504  ;;  %v1597_v52 = vrot.slane %v1525_v47, 4  ;;  %v1642_v56 = vrot.slane %v1551_v54, 6  ;;  %v1659_v63 = vrot.slane %v1563_v58, 4 }
 0x2d7   : > { %v4821_v34 = vsel %vm1506_vm8, %v1503_v31, %v1505_v33  ;;  %v4823_v35 = vsel %vm1506_vm8, %v1505_v33, 0.0  ;;  %v1571_v31 = vsel %vm1570_vm12, %v4489_v27, %v4490_v25  ;;  %vm1623_vm8 = vcmask 916480  }
 0x2d8   : > { %1632 = vrot.lane.b32.xlu0 %v4823_v35, %s4597_s1  ;;  %1630 = vrot.lane.b32.xlu1 %v4821_v34, %s4597_s1  ;;  %v1582_v37 = vrot.slane %v4823_v35, 6  ;;  %v1674_v44 = vrot.slane %v4821_v34, 2  ;;  %v1581_v46 = vrot.slane %v4821_v34, 6  ;;  %v1675_v53 = vrot.slane %v4823_v35, 2  ;;  %s4282_s1 = sshll.u32 %s458_s0, 3 }
 0x2d9   : > { %v1553_v59 = vmul.f32 %v4470_v49, %v4823_v35  ;;  %v1552_v2 = vmul.f32 %v1547_v61, %v4821_v34  ;;  %v1526_v3 = vmul.f32 %v1521_v62, %v4821_v34  ;;  %v1527_v7 = vmul.f32 %v4475_v55, %v4823_v35 }
 0x2da   : > { %v4483_v39 = vpop.permute.xlu1 %4482  ;;  %v1564_v11 = vmul.f32 %v1559_v6, %v4821_v34  ;;  %v1565_v22 = vmul.f32 %v4480_v60, %v4823_v35  ;;  %v1576_v33 = vmul.f32 %v1571_v31, %v4821_v34  ;;  %v1577_v40 = vmul.f32 %v4490_v25, %v4823_v35  ;;  %v1712_v60 = vld [vmem:[%s5063_s5] sm:$0x3] }
 0x2db   : > { %v4484_v42 = vunpack.i.l.bf16 %v4483_v39  ;;  %v1644_v0 = vrot.slane %v1553_v59, 6  ;;  %v4485_v8 = vunpack.i.h.bf16 %v4483_v39  ;;  %v1643_v9 = vrot.slane %v1552_v2, 6  ;;  %v2741_v39 = vld [vmem:[%s5066_s8] sm:$0x3] }
 0x2dc   : > { %1587 = vrot.lane.b32.xlu0 %v1582_v37, %s4598_s28  ;;  %1583 = vrot.lane.b32.xlu1 %v1580_v38, %s4598_s28  ;;  %v1598_v10 = vrot.slane %v1526_v3, 4  ;;  %v1599_v16 = vrot.slane %v1527_v7, 4  ;;  %v1660_v21 = vrot.slane %v1564_v11, 4  ;;  %v1661_v28 = vrot.slane %v1565_v22, 4 }
 0x2dd   : > { %v1539_v51 = vmul.f32 %v4484_v42, %v4818_v32  ;;  %v1541_v14 = vmul.f32 %v4485_v8, %v4823_v35  ;;  %v1535_v26 = vsel %vm1534_vm11, %v4484_v42, %v4485_v8  ;;  %v1575_v37 = vmul.f32 %v4489_v27, %v4818_v32  ;;  %v1713_v42 = vld [vmem:[%s5064_s6] sm:$0x3] }
 0x2de   : > { %v1540_v30 = vmul.f32 %v1535_v26, %v4821_v34  ;;  %v1673_v38 = vrot.slane %v4818_v32, 2  ;;  %v1720_v61 = vsel %vm1546_vm9, %v1712_v60, 0  ;;  %v1513_v3 = vmul.f32 %v4811_v4, %v4818_v32 }
 0x2df   : > { %v1614_v57 = vrot.slane %v1539_v51, 2  ;;  %v1616_v29 = vrot.slane %v1541_v14, 2  ;;  %v4878_v2 = vand.u32 4294901760, %v1720_v61  ;;  %v1514_v6 = vmul.f32 %v4814_v5, %v4821_v34 }
 0x2e0   : > { %1678 = vrot.lane.b32.xlu0 %v1674_v44, %s4599_s18  ;;  %1585 = vrot.lane.b32.xlu1 %v1581_v46, %s4598_s28  ;;  %v1615_v36 = vrot.slane %v1540_v30, 2  ;;  %v2260_v44 = vld [vmem:[%s5068_s10] sm:$0x3]  ;;  %vm1696_vm9 = vcmask 769024   ;;  %s4303_s28 = sshll.u32 %s4702_s17, 7  ;;  %s4605_s17 = smov [#allocation2]  }
 0x2e1   : > { %v4893_v34 = vsub.f32 %v1720_v61, %v4878_v2 }
 0x2e4   : > { %1600 = vrot.lane.b32.xlu0 %v1597_v52, %s4600_s20  ;;  %1680 = vrot.lane.b32.xlu1 %v1675_v53, %s4599_s18 }
 0x2e8   : > { %1645 = vrot.lane.b32.xlu1 %v1642_v56, %s4601_s21  ;;  %1617 = vrot.lane.b32.xlu0 %v1614_v57, %s4602_s25 }
 0x2ec   : > { %1662 = vrot.lane.b32.xlu1 %v1659_v63, %s4603_s26  ;;  %1649 = vrot.lane.b32.xlu0 %v1644_v0, %s4601_s21 }
 0x2f0   : > { %1647 = vrot.lane.b32.xlu1 %v1643_v9, %s4601_s21  ;;  %1602 = vrot.lane.b32.xlu0 %v1598_v10, %s4600_s20 }
 0x2f4   : > { %1604 = vrot.lane.b32.xlu1 %v1599_v16, %s4600_s20  ;;  %1664 = vrot.lane.b32.xlu0 %v1660_v21, %s4603_s26  ;;  %s460_s20 = scalar_lea.vmem [#allocation2], %s4282_s1  ;;  %s4529_s1 = sshll.u32 %s4605_s17, 4  ;;  %s4530_s1 = int_to_ptr.vmem [resolvable:$false] %s4529_s1 }
 0x2f5   : > { %s4219_s21 = sshll.u32 %s460_s20, 4  ;;  %s4531_s3 = scalar_lea.vmem %s4530_s1, 256  ;;  %s5018_s21 = int_to_ptr.vmem [resolvable:$true] %s4219_s21 }
 0x2f6   : > { %s4525_s2 = scalar_lea.vmem %s5018_s21, 128  ;;  %p4532_p0 = scmp.lt.s32.totalorder %s5018_s21, %s4530_s1 }
 0x2f7   : > { %p4526_p11 = scmp.ne.s32.totalorder %s5018_s21, %s4525_s2  ;;  %p4533_p1 = scmp.lt.s32.totalorder %s4531_s3, %s4525_s2 }
 0x2f8   : > { %1666 = vrot.lane.b32.xlu1 %v1661_v28, %s4603_s26  ;;  %1621 = vrot.lane.b32.xlu0 %v1616_v29, %s4602_s25 }
 0x2f9   : > { %p4527_p12 = pnand %p4526_p11, %p4719_p5  ;;  %p4534_p2 = por %p4533_p1, %p4532_p0 }
 0x2fb   : > { %p4528_p13 = pneg %p4527_p12 }
 0x2fc   : > { %1692 = vrot.lane.b32.xlu0 %v1576_v33, %s4604_s27  ;;  %1619 = vrot.lane.b32.xlu1 %v1615_v36, %s4602_s25 }
 0x2fd   : > { %p4535_p3 = pnand %p4534_p2, %p4528_p13 }
 0x300   : > { %1690 = vrot.lane.b32.xlu0 %v1575_v37, %s4604_s27  ;;  %1676 = vrot.lane.b32.xlu1 %v1673_v38, %s4599_s18  ;;  %s5016_s18 = scalar_lea.hbm %s5072_s14, %s4303_s28 }
 0x304   : > { %2744 = vperm.xlu0 %4465, %v2741_v39   ;;  %1694 = vrot.lane.b32.xlu1 %v1577_v40, %s4604_s27  ;;  %s4205_s27 = scalar_lea.sflag [#allocation3], %s458_s0 }
 0x308   : > { %4180 = vperm.xlu0 %4465, %v4177_v41   ;;  %1716 = vperm.xlu1 %4491, %v1713_v42  }
 0x30c   : > { %2263 = vperm.xlu1 %4491, %v2260_v44  }
 0x346   : > { %v1629_v46 = vpop.permute.xlu0 %1628 }
 0x34a   : > { %v1633_v47 = vpop.permute.xlu0 %1632  ;;  %v1631_v35 = vpop.permute.xlu1 %1630 }
 0x34b   : > { %v1636_v7 = vsel %vm1634_vm14, %v1631_v35, %v1633_v47  ;;  %v1635_v38 = vsel %vm1634_vm14, %v1629_v46, %v1631_v35 }
 0x34e   : > { %v1588_v48 = vpop.permute.xlu0 %1587  ;;  %v1584_v49 = vpop.permute.xlu1 %1583 }
 0x352   : > { %v4871_v50 = vpop.permute.xlu0 %1678  ;;  %v1586_v51 = vpop.permute.xlu1 %1585 }
 0x353   : > { %v1590_v8 = vsel %vm1589_vm15, %v1584_v49, %v1586_v51  ;;  %v1591_v11 = vsel %vm1589_vm15, %v1586_v51, %v1588_v48 }
 0x354   : > { %v1699_v21 = vsel %vm1014_vm3, %v1513_v3, %v1590_v8  ;;  %v1700_v25 = vsel %vm1014_vm3, %v1514_v6, %v1591_v11 }
 0x356   : > { %v1601_v52 = vpop.permute.xlu0 %1600  ;;  %v1681_v53 = vpop.permute.xlu1 %1680 }
 0x357   : > { %v1684_v4 = vsel %vm1682_vm5, %v4871_v50, %v1681_v53 }
 0x35a   : > { %v1646_v54 = vpop.permute.xlu1 %1645  ;;  %v1618_v55 = vpop.permute.xlu0 %1617 }
 0x35e   : > { %v1663_v56 = vpop.permute.xlu1 %1662  ;;  %v1650_v57 = vpop.permute.xlu0 %1649 }
 0x362   : > { %v1648_v58 = vpop.permute.xlu1 %1647  ;;  %v1603_v59 = vpop.permute.xlu0 %1602 }
 0x363   : > { %v1653_v0 = vsel %vm1651_vm13, %v1648_v58, %v1650_v57  ;;  %v1607_v14 = vsel %vm1606_vm4, %v1601_v52, %v1603_v59  ;;  %v1652_v26 = vsel %vm1651_vm13, %v1646_v54, %v1648_v58  ;;  %v1799_v52 = vand.u32 4294901760, %v4893_v34 }
 0x364   : > { %v1707_v13 = vsel %vm1014_vm3, %v1636_v7, %v1653_v0  ;;  %v1701_v27 = vsel %vm480_vm1, %v1699_v21, %v1607_v14  ;;  %v1706_v42 = vsel %vm1014_vm3, %v1635_v38, %v1652_v26 }
 0x365   : > { %v1800_v0 = vsub.f32 %v4893_v34, %v1799_v52 }
 0x366   : > { %v1605_v62 = vpop.permute.xlu1 %1604  ;;  %v1665_v63 = vpop.permute.xlu0 %1664 }
 0x367   : > { %v1608_v5 = vsel %vm1606_vm4, %v1603_v59, %v1605_v62  ;;  %v1669_v33 = vsel %vm1668_vm6, %v1663_v56, %v1665_v63 }
 0x368   : > { %v1702_v31 = vsel %vm480_vm1, %v1700_v25, %v1608_v5  ;;  %v1708_v48 = vsel %vm480_vm1, %v1706_v42, %v1669_v33 }
 0x36a   : > { %v1667_v9 = vpop.permute.xlu1 %1666  ;;  %v1622_v10 = vpop.permute.xlu0 %1621 }
 0x36b   : > { %v1670_v16 = vsel %vm1668_vm6, %v1665_v63, %v1667_v9 }
 0x36c   : > { %v1709_v32 = vsel %vm480_vm1, %v1707_v13, %v1670_v16  ;;  %v1801_v16 = vand.u32 4294901760, %v1800_v0 }
 0x36d   : > { %v1711_v22 = vsel %vm1703_vm7, %v1709_v32, %v1684_v4 }
 0x36e   : > { %v1693_v28 = vpop.permute.xlu0 %1692  ;;  %v1620_v29 = vpop.permute.xlu1 %1619  ;;  %v1730_v30 = vand.u32 4294901760, %v1711_v22 }
 0x36f   : > { %v1624_v36 = vsel %vm1623_vm8, %v1618_v55, %v1620_v29  ;;  %v1625_v37 = vsel %vm1623_vm8, %v1620_v29, %v1622_v10 }
 0x370   : > { %v1704_v39 = vsel %vm1703_vm7, %v1701_v27, %v1624_v36  ;;  %v1705_v40 = vsel %vm1703_vm7, %v1702_v31, %v1625_v37  ;;  %v4905_v41 = vsub.f32 %v1711_v22, %v1730_v30 }
 0x371   : > { %v1726_v44 = vand.u32 4294901760, %v1705_v40  ;;  %v1728_v47 = vand.u32 4294901760, %v1704_v39 }
 0x372   : > { %v1691_v49 = vpop.permute.xlu0 %1690  ;;  %v1677_v51 = vpop.permute.xlu1 %1676  ;;  %v1822_v53 = vand.u32 4294901760, %v4905_v41 }
 0x373   : > { %v4911_v54 = vsub.f32 %v1705_v40, %v1726_v44  ;;  %v4913_v46 = vsub.f32 %v1704_v39, %v1728_v47  ;;  %v1697_v35 = vsel %vm1696_vm9, %v1691_v49, %v1693_v28  ;;  %v1683_v55 = vsel %vm1682_vm5, %v1677_v51, %v4871_v50 }
 0x374   : > { %v1722_v56 = vsel %vm1014_vm3, %v1697_v35, 0  ;;  %v1710_v57 = vsel %vm1703_vm7, %v1708_v48, %v1683_v55  ;;  %v4304_v58 = vpack.c.bf16 %v1730_v30, %v1726_v44  ;;  %v1823_v3 = vsub.f32 %v4905_v41, %v1822_v53 }
 0x375   : > { %v1816_v59 = vand.u32 4294901760, %v4913_v46  ;;  %v4921_v60 = vand.u32 4294901760, %v1722_v56  ;;  %v1732_v61 = vand.u32 4294901760, %v1710_v57  ;;  %v1810_v62 = vand.u32 4294901760, %v4911_v54 }
 0x376   : > { %4305 = vmatprep.subr.bf16.mxu1 %v4304_v58  ;;  %4317 = vmatprep.subr.bf16.mxu0 %v4304_v58  ;;  %v1695_v63 = vpop.permute.xlu1 %1694  ;;  %v1824_v5 = vand.u32 4294901760, %v1823_v3  ;;  %v4312_v39 = vpack.c.bf16 %v4905_v41, %v4911_v54 }
 0x377   : > { %v1839_v50 = vsub.f32 %v1722_v56, %v4921_v60  ;;  %v4306_v6 = vpack.c.bf16 %v1732_v61, %v1728_v47  ;;  %v1827_v7 = vsub.f32 %v1710_v57, %v1732_v61  ;;  %v1698_v8 = vsel %vm1696_vm9, %v1693_v28, %v1695_v63 }
 0x378   : > { %v1811_v9 = vsub.f32 %v4911_v54, %v1810_v62  ;;  %v1817_v10 = vsub.f32 %v4913_v46, %v1816_v59  ;;  %v1724_v13 = vsel %vm1014_vm3, %v1698_v8, 0  ;;  %v4320_v26 = vpack.c.bf16 %v1822_v53, %v1810_v62 }
 0x379   : > { %v1828_v11 = vand.u32 4294901760, %v1827_v7  ;;  %4307 = vmatpush1.bf16.msra.mxu1 %v4306_v6  ;;  %4319 = vmatpush1.bf16.msra.mxu0 %v4306_v6  ;;  %v1734_v14 = vand.u32 4294901760, %v1724_v13  ;;  %v1840_v21 = vand.u32 4294901760, %v1839_v50  ;;  %v4314_v40 = vpack.c.bf16 %v1827_v7, %v4913_v46 }
 0x37a   : > { %v1812_v4 = vand.u32 4294901760, %v1811_v9  ;;  %v1818_v27 = vand.u32 4294901760, %v1817_v10 }
 0x37b   : > { %v1829_v32 = vsub.f32 %v1827_v7, %v1828_v11  ;;  %v1833_v22 = vsub.f32 %v1724_v13, %v1734_v14  ;;  %1735 = vmatprep.subr.mxu1 %v1734_v14  ;;  %2004 = vmatprep.subr.mxu0 %v1734_v14  ;;  %v4322_v29 = vpack.c.bf16 %v1828_v11, %v1816_v59 }
 0x37c   : > { %v4308_v25 = vpack.c.bf16 %v1824_v5, %v1812_v4  ;;  %v1841_v33 = vsub.f32 %v1839_v50, %v1840_v21 }
 0x37d   : > { %1737 = vmatpush1.msra.mxu1 %v4921_v60  ;;  %2006 = vmatpush1.msra.mxu0 %v4921_v60  ;;  %v1830_v28 = vand.u32 4294901760, %v1829_v32  ;;  %v1834_v30 = vand.u32 4294901760, %v1833_v22 }
 0x37e   : > { %1802 = vmatmul.mubr.f32.vlgmr.msra.gmra.mrb[2].mxu1 %v1801_v16  ;;  %4309 = vmatprep.subr.bf16.mxu1 %v4308_v25  ;;  %v1842_v38 = vand.u32 4294901760, %v1841_v33 }
 0x37f   : > { %2069 = vmatmul.mubr.f32.vlgmr.msra.gmra.mrb[2].mxu0 %v1799_v52  ;;  %4321 = vmatprep.subr.bf16.mxu0 %v4320_v26  ;;  %v4310_v31 = vpack.c.bf16 %v1830_v28, %v1818_v27  ;;  %v1835_v36 = vsub.f32 %v1833_v22, %v1834_v30 }
 0x380   : > { %4323 = vmatpush1.bf16.msra.mxu0 %v4322_v29  ;;  %1902 = vmatprep.mubr.f32.mxu1 %v4589_v1 }
 0x381   : > { %2094 = vmatprep.subr.mxu0 %v1834_v30  ;;  %4311 = vmatpush1.bf16.msra.mxu1 %v4310_v31  ;;  %v1836_v37 = vand.u32 4294901760, %v1835_v36 }
 0x382   : > { %2157 = vmatprep.mubr.f32.mxu0 %v4589_v1 }
 0x383   : > { %1837 = vmatprep.subr.mxu1 %v1836_v37  ;;  %v2745_v30 = vpop.permute.xlu0 %2744 }
 0x384   : > { %2098 = vmatpush1.msra.mxu0 %v1840_v21  ;;  %v2740_v21 = vld [vmem:[%s5065_s7] sm:$0x3] }
 0x385   : > { %4325 = vmatprep.subr.bf16.mxu0 %v4304_v58  ;;  %1843 = vmatpush1.msra.mxu1 %v1842_v38 }
 0x386   : > { %1904 = vmatmul.mubr.f32.vlgmr.msra.gmra.mrb[2].mxu1 %v4878_v2  ;;  %4313 = vmatprep.subr.bf16.mxu1 %v4312_v39 }
 0x387   : > { %2159 = vmatmul.mubr.f32.vlgmr.msra.gmra.mrb[2].mxu0 %v4878_v2  ;;  %4315 = vmatpush1.bf16.msra.mxu1 %v4314_v40  ;;  %v1717_v41 = vpop.permute.xlu1 %1716 }
 0x388   : > { %4327 = vmatpush1.bf16.msra.mxu0 %v4306_v6  ;;  %1924 = vmatprep.subr.mxu1 %v1833_v22  ;;  %v2748_v22 = vsel %vm476_vm0, %v2740_v21, 0  ;;  %v4181_v21 = vpop.permute.xlu0 %4180 }
 0x389   : > { %2174 = vmatprep.subr.mxu0 %v1734_v14  ;;  %1986 = vmatprep.mubr.f32.mxu1 %v4589_v1  ;;  %v2817_v25 = vand.u32 4294901760, %v2748_v22 }
 0x38a   : > { %2235 = vmatprep.mubr.f32.mxu0 %v4589_v1 }
 0x38b   : > { %1927 = vmatpush1.msra.mxu1 %v1839_v50  ;;  %v2818_v26 = vsub.f32 %v2748_v22, %v2817_v25 }
 0x38c   : > { %2176 = vmatpush1.msra.mxu0 %v4921_v60 }
 0x38d   : > { %v2819_v27 = vand.u32 4294901760, %v2818_v26 }
 0x38e   : > { %1989 = vmatmul.mubr.f32.vlgmr.msra.gmra.mrb[2].mxu1 %v4893_v34 }
 0x38f   : > { %2237 = vmatmul.mubr.f32.vlgmr.msra.gmra.mrb[2].mxu0 %v4878_v2  ;;  %2341 = vmatprep.mubr.f32.mxu1 %v4589_v1  ;;  %v2259_v2 = vld [vmem:[%s5067_s9] sm:$0x3]  ;;  %v2820_v28 = vsub.f32 %v2818_v26, %v2819_v27 }
 0x390   : > { %3304 = vmatprep.mubr.f32.mxu0 %v4589_v1  ;;  %v2267_v56 = vsel %vm1010_vm2, %v2259_v2, 0 }
 0x391   : > { %v2342_v58 = vand.u32 4294901760, %v2267_v56  ;;  %v2821_v29 = vand.u32 4294901760, %v2820_v28 }
 0x393   : > { %v2343_v59 = vsub.f32 %v2267_v56, %v2342_v58 }
 0x395   : > { %v2344_v60 = vand.u32 4294901760, %v2343_v59 }
 0x397   : > { %v2345_v50 = vsub.f32 %v2343_v59, %v2344_v60 }
 0x399   : > { %v2346_v11 = vand.u32 4294901760, %v2345_v50 }
 0x461   : > { %v1990_v42 = vpop.f32.mrb[2].mxu1 }
 0x462   : > { %v4332_v44 = vadd.f32 %v1990_v42, %v1717_v41  ;;  %v2238_v47 = vpop.f32.mrb[2].mxu0  ;;  %v1992_v48 = vpop.f32.mrb[3].mxu1 }
 0x463   : > { %v4334_v49 = vadd.f32 %v1992_v48, %v1717_v41  ;;  %v2240_v51 = vpop.f32.mrb[3].mxu0 }
 0x464   : > { %v4333_v52 = vadd.f32 %v4332_v44, %v2238_v47 }
 0x465   : > { %v4335_v53 = vadd.f32 %v4334_v49, %v2240_v51 }
 0x466   : > { %v4293_v54 = vmul.f32 -1.442695, %v4333_v52 }
 0x467   : > { %v4294_v46 = vmul.f32 -1.442695, %v4335_v53 }
 0x468   : > { %4509 = vpow2.f32 %v4293_v54 }
 0x469   : > { %4511 = vpow2.f32 %v4294_v46 }
 0x472   : > { %v4510_v34 = vpop.eup %4509 }
 0x473   : > { %v4512_v35 = vpop.eup %4511  ;;  %v2249_v55 = vadd.f32 1.0, %v4510_v34 }
 0x474   : > { %v2250_v57 = vadd.f32 1.0, %v4512_v35 }
 0x475   : > { %4513 = vrcp.f32 %v2249_v55  ;;  %v2264_v55 = vpop.permute.xlu1 %2263 }
 0x476   : > { %4515 = vrcp.f32 %v2250_v57 }
 0x47f   : > { %v4514_v61 = vpop.eup %4513 }
 0x480   : > { %v4516_v62 = vpop.eup %4515  ;;  %v2255_v63 = vmul.f32 %v4514_v61, %v4333_v52 }
 0x481   : > { %v2256_v0 = vmul.f32 %v4516_v62, %v4335_v53  ;;  %v3215_v62 = vld [vmem:[%s5069_s11] sm:$0xf] }
 0x482   : > { %v2257_v3 = vadd.f32 %v2255_v63, %v4794_v43 }
 0x483   : > { %v2258_v6 = vadd.f32 %v2256_v0, %v4796_v45 }
 0x484   : > { %v2270_v7 = vsel %vm1014_vm3, %v2257_v3, 0  ;;  %v3704_v3 = vsel %vm1010_vm2, %v3215_v62, 0 }
 0x485   : > { %v2277_v8 = vand.u32 4294901760, %v2270_v7  ;;  %v2273_v9 = vsel %vm1014_vm3, %v2258_v6, 0 }
 0x486   : > { %v2275_v10 = vand.u32 4294901760, %v2273_v9 }
 0x487   : > { %v2360_v13 = vsub.f32 %v2270_v7, %v2277_v8  ;;  %v3779_v7 = vand.u32 4294901760, %v3704_v3 }
 0x488   : > { %v2354_v14 = vsub.f32 %v2273_v9, %v2275_v10  ;;  %2276 = vmatprep.subr.mxu1 %v2275_v10 }
 0x489   : > { %2278 = vmatpush1.msra.mxu1 %v2277_v8  ;;  %v2361_v16 = vand.u32 4294901760, %v2360_v13 }
 0x48a   : > { %2347 = vmatmul.mubr.f32.vlgmr.msra.gmra.mrb[4].mxu1 %v2346_v11  ;;  %v2355_v4 = vand.u32 4294901760, %v2354_v14 }
 0x48b   : > { %v2362_v5 = vsub.f32 %v2360_v13, %v2361_v16  ;;  %2427 = vmatprep.mubr.f32.mxu1 %v4589_v1 }
 0x48c   : > { %v2356_v43 = vsub.f32 %v2354_v14, %v2355_v4 }
 0x48d   : > { %v2363_v45 = vand.u32 4294901760, %v2362_v5 }
 0x48e   : > { %v2357_v32 = vand.u32 4294901760, %v2356_v43 }
 0x490   : > { %2358 = vmatprep.subr.mxu1 %v2357_v32 }
 0x491   : > { %2364 = vmatpush1.msra.mxu1 %v2363_v45 }
 0x492   : > { %2429 = vmatmul.mubr.f32.vlgmr.msra.gmra.mrb[4].mxu1 %v2342_v58  ;;  %2437 = vmatprep.subr.mxu1 %v2354_v14 }
 0x493   : > { %2440 = vmatpush1.msra.mxu1 %v2360_v13  ;;  %2503 = vmatprep.mubr.f32.mxu1 %v4589_v1 }
 0x494   : > { %2513 = vmatprep.subr.mxu1 %v2275_v10 }
 0x49a   : > { %2506 = vmatmul.mubr.f32.vlgmr.msra.gmra.mrb[4].mxu1 %v2343_v59 }
 0x49b   : > { %2515 = vmatpush1.msra.mxu1 %v2277_v8  ;;  %2578 = vmatprep.mubr.f32.mxu1 %v4589_v1 }
 0x49c   : > { %2591 = vmatprep.subr.mxu1 %v2355_v4 }
 0x4a2   : > { %2582 = vmatmul.mubr.f32.vlgmr.msra.gmra.mrb[4].mxu1 %v2344_v60 }
 0x4a3   : > { %2595 = vmatpush1.msra.mxu1 %v2361_v16  ;;  %2658 = vmatprep.mubr.f32.mxu1 %v4589_v1 }
 0x4a4   : > { %2667 = vmatprep.subr.mxu1 %v2275_v10  ;;  %v3780_v10 = vsub.f32 %v3704_v3, %v3779_v7 }
 0x4a6   : > { %v3781_v14 = vand.u32 4294901760, %v3780_v10 }
 0x4a8   : > { %v3782_v5 = vsub.f32 %v3780_v10, %v3781_v14 }
 0x4aa   : > { %2660 = vmatmul.mubr.f32.vlgmr.msra.gmra.mrb[4].mxu1 %v2342_v58  ;;  %v3783_v32 = vand.u32 4294901760, %v3782_v5 }
 0x4ab   : > { %2669 = vmatpush1.msra.mxu1 %v2277_v8  ;;  %2732 = vmatprep.mubr.f32.mxu1 %v4589_v1 }
 0x4ac   : > { %2751 = vmatprep.subr.mxu1 %v4750_v15 }
 0x4b2   : > { %2734 = vmatmul.mubr.f32.vlgmr.msra.gmra.mrb[4].mxu1 %v2342_v58 }
 0x4b3   : > { %2753 = vmatpush1.msra.mxu1 %v4747_v12  ;;  %2816 = vmatprep.mubr.f32.mxu1 %v4589_v1 }
 0x4b4   : > { %2833 = vmatprep.subr.mxu1 %v4773_v24 }
 0x4b6   : > { %2822 = vmatmul.mubr.f32.vlgmr.msra.gmra.mrb[6].mxu1 %v2821_v29 }
 0x4b7   : > { %2839 = vmatpush1.msra.mxu1 %v4771_v23  ;;  %2902 = vmatprep.mubr.f32.mxu1 %v4589_v1  ;;  %v3222_v23 = vld [vmem:[%s5070_s12] sm:$0xf] }
 0x4b8   : > { %2912 = vmatprep.subr.mxu1 %v4757_v18 }
 0x4be   : > { %2904 = vmatmul.mubr.f32.vlgmr.msra.gmra.mrb[6].mxu1 %v2817_v25 }
 0x4bf   : > { %2915 = vmatpush1.msra.mxu1 %v4753_v17  ;;  %2978 = vmatprep.mubr.f32.mxu1 %v4589_v1 }
 0x4c0   : > { %2988 = vmatprep.subr.mxu1 %v4750_v15 }
 0x4c6   : > { %2981 = vmatmul.mubr.f32.vlgmr.msra.gmra.mrb[6].mxu1 %v2818_v26 }
 0x4c7   : > { %2990 = vmatpush1.msra.mxu1 %v4747_v12  ;;  %3053 = vmatprep.mubr.f32.mxu1 %v4589_v1 }
 0x4c8   : > { %3066 = vmatprep.subr.mxu1 %v4764_v20  ;;  %v3230_v20 = vsel %vm1010_vm2, %v3222_v23, 0 }
 0x4c9   : > { %v4986_v24 = vand.u32 4294901760, %v3230_v20 }
 0x4ce   : > { %3057 = vmatmul.mubr.f32.vlgmr.msra.gmra.mrb[6].mxu1 %v2819_v27 }
 0x4cf   : > { %3070 = vmatpush1.msra.mxu1 %v4760_v19  ;;  %3133 = vmatprep.mubr.f32.mxu1 %v4589_v1  ;;  %v3306_v19 = vsub.f32 %v3230_v20, %v4986_v24 }
 0x4d0   : > { %3142 = vmatprep.subr.mxu1 %v4750_v15 }
 0x4d1   : > { %v3307_v31 = vand.u32 4294901760, %v3306_v19 }
 0x4d3   : > { %v3308_v39 = vsub.f32 %v3306_v19, %v3307_v31 }
 0x4d5   : > { %v3309_v49 = vand.u32 4294901760, %v3308_v39 }
 0x4d6   : > { %3135 = vmatmul.mubr.f32.vlgmr.msra.gmra.mrb[6].mxu1 %v2817_v25 }
 0x4d7   : > { %3144 = vmatpush1.msra.mxu1 %v4747_v12  ;;  %3207 = vmatprep.mubr.f32.mxu1 %v4589_v1 }
 0x4de   : > { %3209 = vmatmul.mubr.f32.vlgmr.msra.gmra.mrb[6].mxu1 %v2817_v25 }
 0x585   : > { %v2735_v17 = vpop.f32.mrb[4].mxu1 }
 0x586   : > { %v2737_v18 = vpop.f32.mrb[5].mxu1  ;;  %v4336_v58 = vadd.f32 %v2735_v17, %v2264_v55 }
 0x587   : > { %v4337_v56 = vadd.f32 %v2737_v18, %v2264_v55 }
 0x588   : > { %v3218_v60 = vmul.f32 0.1, %v4336_v58  ;;  %vm3216_vm11 = vcmp.ge.f32.partialorder %v4336_v58, 0.0 }
 0x589   : > { %v3219_v57 = vmul.f32 0.1, %v4337_v56  ;;  %vm3217_vm10 = vcmp.ge.f32.partialorder %v4337_v56, 0.0 }
 0x58a   : > { %v3220_v0 = vsel %vm3216_vm11, %v4336_v58, %v3218_v60 }
 0x58b   : > { %v3221_v59 = vsel %vm3217_vm10, %v4337_v56, %v3219_v57  ;;  %v3707_v50 = vsel %vm1014_vm3, %v3220_v0, 0 }
 0x58c   : > { %v3710_v61 = vsel %vm1014_vm3, %v3221_v59, 0  ;;  %v3714_v8 = vand.u32 4294901760, %v3707_v50 }
 0x58d   : > { %v3712_v63 = vand.u32 4294901760, %v3710_v61 }
 0x58e   : > { %v3797_v11 = vsub.f32 %v3707_v50, %v3714_v8 }
 0x58f   : > { %v3791_v6 = vsub.f32 %v3710_v61, %v3712_v63 }
 0x590   : > { %v3798_v16 = vand.u32 4294901760, %v3797_v11 }
 0x591   : > { %v3792_v9 = vand.u32 4294901760, %v3791_v6 }
 0x592   : > { %v3799_v43 = vsub.f32 %v3797_v11, %v3798_v16 }
 0x593   : > { %v3793_v13 = vsub.f32 %v3791_v6, %v3792_v9 }
 0x594   : > { %v3800_v45 = vand.u32 4294901760, %v3799_v43 }
 0x595   : > { %v3794_v4 = vand.u32 4294901760, %v3793_v13 }
 0x5b1   : > { %v3210_v15 = vpop.f32.mrb[6].mxu1 }
 0x5b2   : > { %v4338_v33 = vadd.f32 %v3210_v15, %v2745_v30  ;;  %v3212_v12 = vpop.f32.mrb[7].mxu1 }
 0x5b3   : > { %v4339_v36 = vadd.f32 %v3212_v12, %v2745_v30 }
 0x5b4   : > { %vm3223_vm0 = vcmp.ge.f32.partialorder %v4338_v33, 0.0  ;;  %v3225_v37 = vmul.f32 0.1, %v4338_v33 }
 0x5b5   : > { %vm3224_vm1 = vcmp.ge.f32.partialorder %v4339_v36, 0.0  ;;  %v3226_v38 = vmul.f32 0.1, %v4339_v36 }
 0x5b6   : > { %v3227_v40 = vsel %vm3223_vm0, %v4338_v33, %v3225_v37 }
 0x5b7   : > { %v3233_v41 = vsel %vm1014_vm3, %v3227_v40, 0  ;;  %v3228_v42 = vsel %vm3224_vm1, %v4339_v36, %v3226_v38 }
 0x5b8   : > { %v3240_v44 = vand.u32 4294901760, %v3233_v41  ;;  %v3236_v47 = vsel %vm1014_vm3, %v3228_v42, 0 }
 0x5b9   : > { %v3238_v48 = vand.u32 4294901760, %v3236_v47 }
 0x5ba   : > { %v3323_v51 = vsub.f32 %v3233_v41, %v3240_v44 }
 0x5bb   : > { %v3317_v52 = vsub.f32 %v3236_v47, %v3238_v48  ;;  %3239 = vmatprep.subr.mxu0 %v3238_v48 }
 0x5bc   : > { %3241 = vmatpush1.msra.mxu0 %v3240_v44  ;;  %v3324_v53 = vand.u32 4294901760, %v3323_v51 }
 0x5bd   : > { %3310 = vmatmul.mubr.f32.vlgmr.msra.gmra.mrb[4].mxu0 %v3309_v49  ;;  %v3318_v54 = vand.u32 4294901760, %v3317_v52 }
 0x5be   : > { %v3325_v46 = vsub.f32 %v3323_v51, %v3324_v53  ;;  %3390 = vmatprep.mubr.f32.mxu0 %v4589_v1 }
 0x5bf   : > { %v3319_v2 = vsub.f32 %v3317_v52, %v3318_v54 }
 0x5c0   : > { %v3326_v35 = vand.u32 4294901760, %v3325_v46 }
 0x5c1   : > { %v3320_v34 = vand.u32 4294901760, %v3319_v2 }
 0x5c3   : > { %3321 = vmatprep.subr.mxu0 %v3320_v34 }
 0x5c4   : > { %3327 = vmatpush1.msra.mxu0 %v3326_v35 }
 0x5c5   : > { %3392 = vmatmul.mubr.f32.vlgmr.msra.gmra.mrb[4].mxu0 %v4986_v24  ;;  %3400 = vmatprep.subr.mxu0 %v3317_v52 }
 0x5c6   : > { %3403 = vmatpush1.msra.mxu0 %v3323_v51  ;;  %3466 = vmatprep.mubr.f32.mxu0 %v4589_v1 }
 0x5c7   : > { %3476 = vmatprep.subr.mxu0 %v3238_v48 }
 0x5cd   : > { %3469 = vmatmul.mubr.f32.vlgmr.msra.gmra.mrb[4].mxu0 %v3306_v19 }
 0x5ce   : > { %3478 = vmatpush1.msra.mxu0 %v3240_v44  ;;  %3541 = vmatprep.mubr.f32.mxu0 %v4589_v1 }
 0x5cf   : > { %3554 = vmatprep.subr.mxu0 %v3318_v54 }
 0x5d5   : > { %3545 = vmatmul.mubr.f32.vlgmr.msra.gmra.mrb[4].mxu0 %v3307_v31 }
 0x5d6   : > { %3558 = vmatpush1.msra.mxu0 %v3324_v53  ;;  %3621 = vmatprep.mubr.f32.mxu0 %v4589_v1 }
 0x5d7   : > { %3630 = vmatprep.subr.mxu0 %v3238_v48 }
 0x5dd   : > { %3623 = vmatmul.mubr.f32.vlgmr.msra.gmra.mrb[4].mxu0 %v4986_v24 }
 0x5de   : > { %3632 = vmatpush1.msra.mxu0 %v3240_v44  ;;  %3695 = vmatprep.mubr.f32.mxu0 %v4589_v1 }
 0x5df   : > { %3713 = vmatprep.subr.mxu0 %v3712_v63 }
 0x5e5   : > { %3697 = vmatmul.mubr.f32.vlgmr.msra.gmra.mrb[4].mxu0 %v4986_v24 }
 0x5e6   : > { %3715 = vmatpush1.msra.mxu0 %v3714_v8  ;;  %3778 = vmatprep.mubr.f32.mxu0 %v4589_v1 }
 0x5e7   : > { %3795 = vmatprep.subr.mxu0 %v3794_v4 }
 0x5ed   : > { %3784 = vmatmul.mubr.f32.vlgmr.msra.gmra.mrb[4].mxu0 %v3783_v32 }
 0x5ee   : > { %3801 = vmatpush1.msra.mxu0 %v3800_v45  ;;  %3864 = vmatprep.mubr.f32.mxu0 %v4589_v1 }
 0x5ef   : > { %3874 = vmatprep.subr.mxu0 %v3791_v6 }
 0x5f5   : > { %3866 = vmatmul.mubr.f32.vlgmr.msra.gmra.mrb[4].mxu0 %v3779_v7 }
 0x5f6   : > { %3877 = vmatpush1.msra.mxu0 %v3797_v11  ;;  %3940 = vmatprep.mubr.f32.mxu0 %v4589_v1 }
 0x5f7   : > { %3950 = vmatprep.subr.mxu0 %v3712_v63 }
 0x5fd   : > { %3943 = vmatmul.mubr.f32.vlgmr.msra.gmra.mrb[4].mxu0 %v3780_v10 }
 0x5fe   : > { %3952 = vmatpush1.msra.mxu0 %v3714_v8  ;;  %4015 = vmatprep.mubr.f32.mxu0 %v4589_v1 }
 0x5ff   : > { %4028 = vmatprep.subr.mxu0 %v3792_v9 }
 0x605   : > { %4019 = vmatmul.mubr.f32.vlgmr.msra.gmra.mrb[4].mxu0 %v3781_v14 }
 0x606   : > { %4032 = vmatpush1.msra.mxu0 %v3798_v16  ;;  %4095 = vmatprep.mubr.f32.mxu0 %v4589_v1 }
 0x607   : > { %4104 = vmatprep.subr.mxu0 %v3712_v63 }
 0x60d   : > { %4097 = vmatmul.mubr.f32.vlgmr.msra.gmra.mrb[4].mxu0 %v3779_v7 }
 0x60e   : > { %4106 = vmatpush1.msra.mxu0 %v3714_v8  ;;  %4169 = vmatprep.mubr.f32.mxu0 %v4589_v1 }
 0x615   : > { %4171 = vmatmul.mubr.f32.vlgmr.msra.gmra.mrb[4].mxu0 %v3779_v7 }
 0x6e8   : > { %v4172_v22 = vpop.f32.mrb[4].mxu0 }
 0x6e9   : > { %v4183_v25 = vadd.f32 %v4181_v21, %v4172_v22  ;;  %v4174_v26 = vpop.f32.mrb[5].mxu0 }
 0x6ea   : > { %v4184_v27 = vadd.f32 %v4181_v21, %v4174_v26 }
 0x6eb   : > { %v4295_v28 = vmul.f32 -1.442695, %v4183_v25 }
 0x6ec   : > { %v4296_v29 = vmul.f32 -1.442695, %v4184_v27 }
 0x6ed   : > { %4517 = vpow2.f32 %v4295_v28 }
 0x6ee   : > { %4519 = vpow2.f32 %v4296_v29 }
 0x6f7   : > { %v4518_v17 = vpop.eup %4517 }
 0x6f8   : > { %v4520_v18 = vpop.eup %4519  ;;  %v4191_v23 = vadd.f32 1.0, %v4518_v17 }
 0x6f9   : > { %v4192_v20 = vadd.f32 1.0, %v4520_v18 }
 0x6fa   : > { %4521 = vrcp.f32 %v4191_v23 }
 0x6fb   : > { %4523 = vrcp.f32 %v4192_v20 }
 0x704   : > { %v4522_v1 = vpop.eup %4521 }
 0x705   : > { %v4524_v24 = vpop.eup %4523  ;;  %v4197_v19 = vmul.f32 %v4522_v1, %v4183_v25 }
 0x706   : > { %v4198_v30 = vmul.f32 %v4524_v24, %v4184_v27 }
 0x708   : > { %v4201_v15 = vcombine.low %v4197_v19, %v4198_v30 }
 0x70a   : > { %4203 = vst [vmem:[%s460_s20] sm:$0xff] %v4201_v15 }
 0x70b   : > { %4538 = shalt.err (!%p4535_p3)
}
 0x70c   : > { %s4539_s0 = scalar_lea.hbm %s5016_s18, 128  ;;  %s4543_s25 = scalar_lea.hbm %s5072_s14, 256 }
 0x70d   : > { %p4540_p4 = scmp.ne.s32.totalorder %s5016_s18, %s4539_s0  ;;  %p4544_p9 = scmp.lt.u32.totalorder %s5016_s18, %s5072_s14 }
 0x70e   : > { %p4545_p10 = scmp.lt.u32.totalorder %s4543_s25, %s4539_s0  ;;  %p4547_p12 = scmp.lt.u32.totalorder %s4539_s0, %s5016_s18 }
 0x70f   : > { %p4541_p7 = pnand %p4540_p4, %p4719_p5 }
 0x710   : > { %p4546_p11 = por %p4545_p10, %p4544_p9 }
 0x711   : > { %p4542_p8 = pneg %p4541_p7 }
 0x712   : > { %p4548_p13 = por %p4547_p12, %p4546_p11 }
 0x714   : > { %p4549_p0 = pnand %p4548_p13, %p4542_p8 }
 0x716   : > { %4552 = shalt.err (!%p4549_p0)
}
 0x717   : > { %4410 = dma.vmem_to_hbm [thread:$0]  (%p4719_p5), %s5018_s21, 128, %s5016_s18, %s4205_s27  }
 0x718 PF: > { %p4416_p1 = scmp.ge.s32.totalorder %s4587_s16, 2  ;;  %s4231_s2 = sand.u32 1, %s4575_s29  }
 0x719   : > { %s4232_s3 = scalar_lea.sflag [#allocation3], %s4231_s2 }
 0x71a   : > { %p4413_p2 = pnand %p4416_p1, %p4723_p6 }
 0x71c   : > { %4570 = dma.done.wait (!%p4413_p2), %s4232_s3, 128  }
 0x71d   : > { %4572 = vsyncadd (!%p4413_p2), %s4232_s3, 4294967168  ;;  %p24_p3 = scmp.ge.s32.totalorder %s4706_s19, 4   ;;  %s5083_s29 = smov %s4579_s30 }
 0x71e   : > { %s5084_s30 = smov %s4583_s15  ;;  %s5085_s15 = smov %s4717_s22 }
 0x71f   : > { %s5086_s16 = smov %s4706_s19  ;;  %26 = sbr.rel (!%p24_p3) target bundleno = 8 (0x8), region = 111 }
 0x726   :  { %4237 = vsyncpa [#allocation3], 1 }
 0x727   :  { %4239 = vsyncpa [#allocation3 + $0x1], 1 }

</bundles_post_ra>
